<compile_context>
chip_gen: v7x
topology: tpu7x:2x2x1
jax: 0.10.0
libtpu: 0.0.40
codegen_flags: <defaults>
</compile_context>

<pallas_src>
import functools

import jax
import jax.numpy as jnp
from jax import lax
from jax.experimental import pallas as pl
from jax.experimental.pallas import tpu as pltpu

EPS = 1e-5


def _round_up(x, m):
    return ((x + m - 1) // m) * m


def _vmem_capacity_bytes():
    try:
        return int(pltpu.get_tpu_info().vmem_capacity_bytes)
    except Exception:
        pass
    try:
        kind = jax.devices()[0].device_kind.lower()
        if "v7" in kind:
            return 64 << 20
    except Exception:
        pass
    return 128 << 20


_VMEM_CAP = _vmem_capacity_bytes()
_SMALL_VMEM = _VMEM_CAP <= (96 << 20)          # v7x-class core (64 MiB VMEM)
_VMEM_LIMIT = (48 << 20) if _SMALL_VMEM else (64 << 20)
_TM_TARGET = 512 if _SMALL_VMEM else 1024      # GEMM M tile
_TN_TARGET = 256                               # GEMM N (Cout) tile, multiple of 128
_TK_TARGET = 256 if _SMALL_VMEM else 512       # GEMM K tile, multiple of 128


# ----------------------------------------------------------------------------- kernels


def _gemm_stats_kernel(a_ref, w_ref, y_ref, stats_ref, acc_ref):
    """Tiled GEMM (bf16/f32 in, f32 acc) + per-tile channel sum / sumsq outputs."""
    kk = pl.program_id(2)

    @pl.when(kk == 0)
    def _():
        acc_ref[...] = jnp.zeros_like(acc_ref)

    acc_ref[...] += jnp.dot(a_ref[...], w_ref[...],
                            preferred_element_type=jnp.float32)

    @pl.when(kk == pl.num_programs(2) - 1)
    def _():
        y = acc_ref[...]                                     # (TM, TN) f32
        y_ref[...] = y.astype(y_ref.dtype)
        s = jnp.sum(y, axis=0, keepdims=True)                # (1, TN)
        q = jnp.sum(y * y, axis=0, keepdims=True)            # (1, TN)
        stats_ref[...] = jnp.concatenate([s, q], axis=0)[None, :, :]   # (1, 2, TN)


def _affine_relu_kernel(y_ref, a_ref, b_ref, o_ref):
    """relu(y * a + b) — BatchNorm folded into one per-channel FMA + ReLU."""
    o_ref[...] = jnp.maximum(y_ref[...] * a_ref[...] + b_ref[...], 0.0).astype(o_ref.dtype)


# ----------------------------------------------------------------------------- wrapper


def _im2col(x_nchw, kh, kw, stride, padding):
    """NHWC-flat im2col patches (kept in x's dtype, e.g. bf16, to halve HBM bytes)."""
    n, cin, h, w = x_nchw.shape
    oh = (h + 2 * padding - kh) // stride + 1
    ow = (w + 2 * padding - kw) // stride + 1
    x_pad = jnp.pad(x_nchw, ((0, 0), (0, 0), (padding, padding), (padding, padding)))
    cols = []
    for i in range(kh):
        for j in range(kw):
            cols.append(
                x_pad[:, :, i : i + oh * stride : stride, j : j + ow * stride : stride]
            )  # (N, Cin, OH, OW)
    patches = jnp.stack(cols, axis=2)                 # (N, Cin, KH*KW, OH, OW)
    patches = patches.transpose(0, 3, 4, 1, 2)        # (N, OH, OW, Cin, KH*KW)
    patches = patches.reshape(n * oh * ow, cin * kh * kw)
    return patches, oh, ow


@functools.partial(jax.jit, static_argnames=("stride", "padding", "compute_dtype"))
def conv_block_forward(x_nchw, weight, gamma, beta, *, stride, padding,
                       compute_dtype=jnp.bfloat16):
    """Conv2d(bias=False) -> BatchNorm2d(training stats) -> ReLU. NCHW in / NCHW out."""
    n, cin, _, _ = x_nchw.shape
    cout, _, kh, kw = weight.shape

    # MXU operands in compute_dtype (bf16 fast path); all accumulation / BN math in f32.
    xc = x_nchw.astype(compute_dtype)
    wc = weight.astype(compute_dtype)

    patches, oh, ow = _im2col(xc, kh, kw, stride, padding)    # (M, K)
    m, k = patches.shape
    w_mat = wc.reshape(cout, cin * kh * kw).T                 # (K, Cout)

    # Generation-aware tile sizes; pad every dim to a tile multiple with zeros
    # (zero rows/cols are exact no-ops for both the GEMM and the stats sums).
    tn = min(_TN_TARGET, _round_up(cout, 128))
    tk = min(_TK_TARGET, _round_up(k, 128))
    tm = min(_TM_TARGET, _round_up(m, 8))
    mp = _round_up(m, tm)
    kp = _round_up(k, tk)
    cp = _round_up(cout, tn)

    patches_p = jnp.pad(patches, ((0, mp - m), (0, kp - k)))
    w_mat_p = jnp.pad(w_mat, ((0, kp - k), (0, cp - cout)))

    gm, gn, gk = mp // tm, cp // tn, kp // tk
    itemsize = patches_p.dtype.itemsize

    cost = pl.CostEstimate(
        flops=2 * mp * kp * cp,
        transcendentals=0,
        bytes_accessed=mp * kp * itemsize * gn + kp * cp * itemsize * gm + mp * cp * 4,
    )

    # -------- pass 1: tiled conv GEMM + per-tile channel sum / sumsq --------
    y_flat, stats = pl.pallas_call(
        _gemm_stats_kernel,
        out_shape=(
            jax.ShapeDtypeStruct((mp, cp), jnp.float32),       # conv output (NHWC-flat)
            jax.ShapeDtypeStruct((gm, 2, cp), jnp.float32),    # per-M-tile [sum, sumsq]
        ),
        grid_spec=pltpu.PrefetchScalarGridSpec(
            num_scalar_prefetch=0,
            grid=(gm, gn, gk),
            in_specs=[
                pl.BlockSpec((tm, tk), lambda i, j, kk: (i, kk)),
                pl.BlockSpec((tk, tn), lambda i, j, kk: (kk, j)),
            ],
            out_specs=[
                pl.BlockSpec((tm, tn), lambda i, j, kk: (i, j)),
                pl.BlockSpec((1, 2, tn), lambda i, j, kk: (i, 0, j)),
            ],
            scratch_shapes=[pltpu.VMEM((tm, tn), jnp.float32)],
        ),
        compiler_params=pltpu.CompilerParams(
            dimension_semantics=("parallel", "parallel", "arbitrary"),
            vmem_limit_bytes=_VMEM_LIMIT,
        ),
        cost_estimate=cost,
    )(patches_p, w_mat_p)

    # -------- fold BN into a single per-channel affine (tiny, done in JAX) --------
    # Zero-padded M rows contribute 0 to sum/sumsq, so dividing by the real M is exact.
    sums = jnp.sum(stats[:, 0, :], axis=0)                     # (cp,)
    sqs = jnp.sum(stats[:, 1, :], axis=0)                      # (cp,)
    inv_m = jnp.float32(1.0 / m)
    mean = sums * inv_m
    var = jnp.maximum(sqs * inv_m - mean * mean, 0.0)          # one-pass var, clamped
    inv_std = lax.rsqrt(var + EPS)
    gamma_p = jnp.pad(gamma.astype(jnp.float32), (0, cp - cout))
    beta_p = jnp.pad(beta.astype(jnp.float32), (0, cp - cout))
    a_vec = (gamma_p * inv_std).reshape(1, cp)
    b_vec = (beta_p - mean * gamma_p * inv_std).reshape(1, cp)

    # -------- pass 2: lane-dense folded-BN affine + ReLU --------
    out_flat = pl.pallas_call(
        _affine_relu_kernel,
        out_shape=jax.ShapeDtypeStruct((mp, cp), jnp.float32),
        grid_spec=pltpu.PrefetchScalarGridSpec(
            num_scalar_prefetch=0,
            grid=(gm, gn),
            in_specs=[
                pl.BlockSpec((tm, tn), lambda i, j: (i, j)),
                pl.BlockSpec((1, tn), lambda i, j: (0, j)),
                pl.BlockSpec((1, tn), lambda i, j: (0, j)),
            ],
            out_specs=pl.BlockSpec((tm, tn), lambda i, j: (i, j)),
        ),
        compiler_params=pltpu.CompilerParams(
            dimension_semantics=("parallel", "parallel"),
            vmem_limit_bytes=_VMEM_LIMIT,
        ),
    )(y_flat, a_vec, b_vec)

    # Slice off M/Cout padding; NHWC-flat -> NCHW only at the module boundary.
    out = out_flat[:m, :cout].reshape(n, oh, ow, cout).transpose(0, 3, 1, 2)
    return out


# ----------------------------------------------------------------------------- reference


def _reference(x_nchw, weight, gamma, beta, stride, padding):
    """Pure-JAX replica of the PyTorch ConvBlock (training-mode BatchNorm)."""
    y = lax.conv_general_dilated(
        x_nchw.astype(jnp.float32),
        weight.astype(jnp.float32),
        window_strides=(stride, stride),
        padding=[(padding, padding), (padding, padding)],
        dimension_numbers=("NCHW", "OIHW", "NCHW"),
    )
    mean = jnp.mean(y, axis=(0, 2, 3), keepdims=True)
    var = jnp.mean((y - mean) ** 2, axis=(0, 2, 3), keepdims=True)
    y_hat = (y - mean) * lax.rsqrt(var + EPS)
    y_hat = y_hat * gamma.reshape(1, -1, 1, 1) + beta.reshape(1, -1, 1, 1)
    return jnp.maximum(y_hat, 0.0)


if __name__ == "__main__":
    # ConvBlock(in_channels=4, out_channels=8, kernel_size=3, stride=1, padding=1)
    N, CIN, COUT, H, W = 2, 4, 8, 16, 16
    KH = KW = 3
    STRIDE, PADDING = 1, 1

    key = jax.random.PRNGKey(0)
    kx, kw_, kg, kb = jax.random.split(key, 4)

    x = jax.random.normal(kx, (N, CIN, H, W), dtype=jnp.float32)
    weight = 0.1 * jax.random.normal(kw_, (COUT, CIN, KH, KW), dtype=jnp.float32)
    gamma = 1.0 + 0.1 * jax.random.normal(kg, (COUT,), dtype=jnp.float32)
    beta = 0.1 * jax.random.normal(kb, (COUT,), dtype=jnp.float32)

    # (1) Exact-semantics check: f32 operands vs f32 reference, tight tolerance.
    out_f32 = jax.block_until_ready(
        conv_block_forward(x, weight, gamma, beta, stride=STRIDE, padding=PADDING,
                           compute_dtype=jnp.float32))
    ref = _reference(x, weight, gamma, beta, STRIDE, PADDING)
    assert out_f32.shape == (N, COUT, H, W), out_f32.shape
    assert jnp.allclose(out_f32, ref, atol=1e-4, rtol=1e-4), \
        float(jnp.max(jnp.abs(out_f32 - ref)))

    # (2) Fast path: bf16 MXU operands (f32 accumulation / BN stats),
    #     compared against the reference run on bf16-rounded inputs.
    out_bf16 = jax.block_until_ready(
        conv_block_forward(x, weight, gamma, beta, stride=STRIDE, padding=PADDING,
                           compute_dtype=jnp.bfloat16))
    ref_bf16 = _reference(
        x.astype(jnp.bfloat16).astype(jnp.float32),
        weight.astype(jnp.bfloat16).astype(jnp.float32),
        gamma, beta, STRIDE, PADDING)
    assert out_bf16.shape == (N, COUT, H, W), out_bf16.shape
    assert jnp.allclose(out_bf16, ref_bf16, atol=1e-2, rtol=1e-2), \
        float(jnp.max(jnp.abs(out_bf16 - ref_bf16)))

    print("KERNEL_OK")
</pallas_src>

<mosaic_0001>
module attributes {stable_mosaic.version = 11 : i64} {
  func.func @_gemm_stats_kernel(%arg0: i32, %arg1: i32, %arg2: i32, %arg3: memref<512x128xf32, #tpu.memory_space<vmem>>, %arg4: memref<128x128xf32, #tpu.memory_space<vmem>>, %arg5: memref<512x128xf32, #tpu.memory_space<vmem>>, %arg6: memref<1x2x128xf32, #tpu.memory_space<vmem>>, %arg7: memref<512x128xf32, #tpu.memory_space<vmem>>) attributes {dimension_semantics = [#tpu.dimension_semantics<parallel>, #tpu.dimension_semantics<parallel>, #tpu.dimension_semantics<arbitrary>], iteration_bounds = array<i64: 1, 1, 1>, scalar_prefetch = 0 : i64, scratch_operands = 1 : i64, tpu.core_type = #tpu.core_type<tc>, window_params = [{transform_indices = @transform_0, window_bounds = array<i64: 512, 128>}, {transform_indices = @transform_1, window_bounds = array<i64: 128, 128>}, {transform_indices = @transform_2, window_bounds = array<i64: 512, 128>}, {transform_indices = @transform_3, window_bounds = array<i64: 1, 2, 128>}]} {
    %c0_i32 = arith.constant 0 : i32
    %0 = arith.cmpi eq, %arg2, %c0_i32 : i32
    %1 = arith.extui %0 : i1 to i32
    %c0_i32_0 = arith.constant 0 : i32
    %2 = arith.cmpi ne, %1, %c0_i32_0 : i32
    scf.if %2 {
      %cst_10 = arith.constant 0.000000e+00 : f32
      %12 = vector.broadcast %cst_10 : f32 to vector<512x128xf32>
      %c0_11 = arith.constant 0 : index
      %c0_12 = arith.constant 0 : index
      %13 = vector.load %arg7[%c0_11, %c0_12] : memref<512x128xf32, #tpu.memory_space<vmem>>, vector<512x128xf32>
      tpu.vector_store %arg7[%c0_11, %c0_12], %12 {strides = array<i32>} : memref<512x128xf32, #tpu.memory_space<vmem>>, vector<512x128xf32>,
    } else {
    }
    %c0 = arith.constant 0 : index
    %c0_1 = arith.constant 0 : index
    %3 = vector.load %arg7[%c0, %c0_1] : memref<512x128xf32, #tpu.memory_space<vmem>>, vector<512x128xf32>
    %c0_2 = arith.constant 0 : index
    %c0_3 = arith.constant 0 : index
    %4 = vector.load %arg3[%c0_2, %c0_3] : memref<512x128xf32, #tpu.memory_space<vmem>>, vector<512x128xf32>
    %c0_4 = arith.constant 0 : index
    %c0_5 = arith.constant 0 : index
    %5 = vector.load %arg4[%c0_4, %c0_5] : memref<128x128xf32, #tpu.memory_space<vmem>>, vector<128x128xf32>
    %cst = arith.constant dense<0.000000e+00> : vector<512x128xf32>
    %6 = tpu.matmul %4, %5, %cst {dimension_numbers = #tpu.dot_dimension_numbers<[1], [0], [0], [1], [0, 0, 1, 1], [], []>} : vector<512x128xf32>, vector<128x128xf32>, vector<512x128xf32> -> vector<512x128xf32>
    %7 = arith.addf %3, %6 : vector<512x128xf32>
    %c0_6 = arith.constant 0 : index
    %c0_7 = arith.constant 0 : index
    %8 = vector.load %arg7[%c0_6, %c0_7] : memref<512x128xf32, #tpu.memory_space<vmem>>, vector<512x128xf32>
    tpu.vector_store %arg7[%c0_6, %c0_7], %7 {strides = array<i32>} : memref<512x128xf32, #tpu.memory_space<vmem>>, vector<512x128xf32>,
    %c0_i32_8 = arith.constant 0 : i32
    %9 = arith.cmpi eq, %arg2, %c0_i32_8 : i32
    %10 = arith.extui %9 : i1 to i32
    %c0_i32_9 = arith.constant 0 : i32
    %11 = arith.cmpi ne, %10, %c0_i32_9 : i32
    scf.if %11 {
      %c0_10 = arith.constant 0 : index
      %c0_11 = arith.constant 0 : index
      %12 = vector.load %arg7[%c0_10, %c0_11] : memref<512x128xf32, #tpu.memory_space<vmem>>, vector<512x128xf32>
      %c0_12 = arith.constant 0 : index
      %c0_13 = arith.constant 0 : index
      %13 = vector.load %arg5[%c0_12, %c0_13] : memref<512x128xf32, #tpu.memory_space<vmem>>, vector<512x128xf32>
      tpu.vector_store %arg5[%c0_12, %c0_13], %12 {strides = array<i32>} : memref<512x128xf32, #tpu.memory_space<vmem>>, vector<512x128xf32>,
      %cst_14 = arith.constant dense<0.000000e+00> : vector<128xf32>
      %14 = vector.multi_reduction <add>, %12, %cst_14 [0] : vector<512x128xf32> to vector<128xf32>
      %15 = vector.shape_cast %14 : vector<128xf32> to vector<1x128xf32>
      %16 = arith.mulf %12, %12 : vector<512x128xf32>
      %cst_15 = arith.constant dense<0.000000e+00> : vector<128xf32>
      %17 = vector.multi_reduction <add>, %16, %cst_15 [0] : vector<512x128xf32> to vector<128xf32>
      %18 = vector.shape_cast %17 : vector<128xf32> to vector<1x128xf32>
      %19 = tpu.concatenate %15, %18 in 0 : vector<1x128xf32>, vector<1x128xf32> -> vector<2x128xf32>
      %20 = vector.shape_cast %19 : vector<2x128xf32> to vector<1x2x128xf32>
      %c0_16 = arith.constant 0 : index
      %c0_17 = arith.constant 0 : index
      %c0_18 = arith.constant 0 : index
      %21 = vector.load %arg6[%c0_16, %c0_17, %c0_18] : memref<1x2x128xf32, #tpu.memory_space<vmem>>, vector<1x2x128xf32>
      tpu.vector_store %arg6[%c0_16, %c0_17, %c0_18], %20 {strides = array<i32>} : memref<1x2x128xf32, #tpu.memory_space<vmem>>, vector<1x2x128xf32>,
    } else {
    }
    return
  }
  func.func @transform_0(%arg0: i32, %arg1: i32, %arg2: i32) -> (i32, i32) {
    %c0_i32 = arith.constant 0 : i32
    return %arg0, %arg2 : i32, i32
  }
  func.func @transform_1(%arg0: i32, %arg1: i32, %arg2: i32) -> (i32, i32) {
    %c0_i32 = arith.constant 0 : i32
    return %arg2, %arg1 : i32, i32
  }
  func.func @transform_2(%arg0: i32, %arg1: i32, %arg2: i32) -> (i32, i32) {
    %c0_i32 = arith.constant 0 : i32
    return %arg0, %arg1 : i32, i32
  }
  func.func @transform_3(%arg0: i32, %arg1: i32, %arg2: i32) -> (i32, i32, i32) {
    %c0_i32 = arith.constant 0 : i32
    %c0_i32_0 = arith.constant 0 : i32
    return %arg0, %c0_i32, %arg1 : i32, i32, i32
  }
}

module attributes {stable_mosaic.version = 11 : i64} {
  func.func @_affine_relu_kernel(%arg0: i32, %arg1: i32, %arg2: memref<512x128xf32, #tpu.memory_space<vmem>>, %arg3: memref<1x128xf32, #tpu.memory_space<vmem>>, %arg4: memref<1x128xf32, #tpu.memory_space<vmem>>, %arg5: memref<512x128xf32, #tpu.memory_space<vmem>>) attributes {dimension_semantics = [#tpu.dimension_semantics<parallel>, #tpu.dimension_semantics<parallel>], iteration_bounds = array<i64: 1, 1>, scalar_prefetch = 0 : i64, scratch_operands = 0 : i64, tpu.core_type = #tpu.core_type<tc>, window_params = [{transform_indices = @transform_0, window_bounds = array<i64: 512, 128>}, {transform_indices = @transform_1, window_bounds = array<i64: 1, 128>}, {transform_indices = @transform_2, window_bounds = array<i64: 1, 128>}, {transform_indices = @transform_3, window_bounds = array<i64: 512, 128>}]} {
    %c0 = arith.constant 0 : index
    %c0_0 = arith.constant 0 : index
    %0 = vector.load %arg2[%c0, %c0_0] : memref<512x128xf32, #tpu.memory_space<vmem>>, vector<512x128xf32>
    %c0_1 = arith.constant 0 : index
    %c0_2 = arith.constant 0 : index
    %1 = vector.load %arg3[%c0_1, %c0_2] : memref<1x128xf32, #tpu.memory_space<vmem>>, vector<1x128xf32>
    %2 = vector.broadcast %1 : vector<1x128xf32> to vector<512x128xf32>
    %3 = arith.mulf %0, %2 : vector<512x128xf32>
    %c0_3 = arith.constant 0 : index
    %c0_4 = arith.constant 0 : index
    %4 = vector.load %arg4[%c0_3, %c0_4] : memref<1x128xf32, #tpu.memory_space<vmem>>, vector<1x128xf32>
    %5 = vector.broadcast %4 : vector<1x128xf32> to vector<512x128xf32>
    %6 = arith.addf %3, %5 : vector<512x128xf32>
    %cst = arith.constant 0.000000e+00 : f32
    %7 = vector.broadcast %cst : f32 to vector<512x128xf32>
    %8 = arith.maximumf %6, %7 : vector<512x128xf32>
    %c0_5 = arith.constant 0 : index
    %c0_6 = arith.constant 0 : index
    %9 = vector.load %arg5[%c0_5, %c0_6] : memref<512x128xf32, #tpu.memory_space<vmem>>, vector<512x128xf32>
    tpu.vector_store %arg5[%c0_5, %c0_6], %8 {strides = array<i32>} : memref<512x128xf32, #tpu.memory_space<vmem>>, vector<512x128xf32>,
    return
  }
  func.func @transform_0(%arg0: i32, %arg1: i32) -> (i32, i32) {
    %c0_i32 = arith.constant 0 : i32
    return %arg0, %arg1 : i32, i32
  }
  func.func @transform_1(%arg0: i32, %arg1: i32) -> (i32, i32) {
    %c0_i32 = arith.constant 0 : i32
    %c0_i32_0 = arith.constant 0 : i32
    return %c0_i32, %arg1 : i32, i32
  }
  func.func @transform_2(%arg0: i32, %arg1: i32) -> (i32, i32) {
    %c0_i32 = arith.constant 0 : i32
    %c0_i32_0 = arith.constant 0 : i32
    return %c0_i32, %arg1 : i32, i32
  }
  func.func @transform_3(%arg0: i32, %arg1: i32) -> (i32, i32) {
    %c0_i32 = arith.constant 0 : i32
    return %arg0, %arg1 : i32, i32
  }
}

</mosaic_0001>

<bundles_post_ra>
// kernel: conv_block_forward.3
= control target key start
LH: loop header
LB: loop body
LE: loop exit
PB: predicated region body
PF: predicated region fallthrough
CT: control target
= control target key end

     0   :  { %8 = vsyncpa [#allocation3], 0  ;;  %s725_s0 = inlined_call_operand.hbm [shape: f32[512,128], index: 0, kind: input, shape index: {}]   ;;  %s726_s1 = inlined_call_operand.hbm [shape: f32[1,128], index: 1, kind: input, shape index: {}]   ;;  %s727_s2 = inlined_call_operand.hbm [shape: f32[1,128], index: 2, kind: input, shape index: {}]   ;;  %s728_s3 = inlined_call_operand.hbm [shape: f32[512,128], index: 3, kind: output, shape index: {}]  }
   0x1   :  { %9 = vsyncpa [#allocation6], 0 }
   0x2   :  { %10 = vsyncpa [#allocation4], 0  ;;  %s506_s12 = smov [#allocation5]   ;;  %s507_s14 = smov [#allocation2]  }
   0x3   :  { %s29_s13 = sshll.u32 %s506_s12, 4  ;;  %s16_s15 = sshll.u32 %s507_s14, 4  ;;  %s30_s13 = int_to_ptr.vmem [resolvable:$true] %s29_s13  ;;  %s532_s15 = int_to_ptr.vmem [resolvable:$true] %s16_s15 }
   0x4   :  { %s412_s18 = scalar_lea.hbm %s726_s1, 16 }
   0x5   :  { %p413_p0 = scmp.ne.s32.totalorder %s726_s1, %s412_s18  ;;  %p416_p1 = scmp.lt.u32.totalorder %s412_s18, %s726_s1 }
   0x7   :  { %p418_p2 = pnand %p416_p1, %p413_p0 }
   0x9   :  { %421 = shalt.err (!%p418_p2)
}
   0xa   :  { %s422_s23 = scalar_lea.vmem %s30_s13, 16  ;;  %s426_s24 = scalar_lea.vmem %s30_s13, 32 }
   0xb   :  { %p423_p3 = scmp.ne.s32.totalorder %s30_s13, %s422_s23  ;;  %p427_p4 = scmp.lt.s32.totalorder %s30_s13, %s30_s13 }
   0xc   :  { %p428_p5 = scmp.lt.s32.totalorder %s426_s24, %s422_s23 }
   0xe   :  { %p429_p6 = por %p428_p5, %p427_p4 }
  0x10   :  { %p430_p7 = pnand %p429_p6, %p423_p3 }
  0x12   :  { %433 = shalt.err (!%p430_p7)
}
  0x13   :  { %32 = dma.hbm_to_vmem [thread:$0]  %s726_s1, 16, %s30_s13, [#allocation6]  }
  0x14   :  { %s434_s29 = scalar_lea.hbm %s725_s0, 8192 }
  0x15   :  { %p435_p8 = scmp.ne.s32.totalorder %s725_s0, %s434_s29  ;;  %p438_p9 = scmp.lt.u32.totalorder %s434_s29, %s725_s0 }
  0x17   :  { %p440_p10 = pnand %p438_p9, %p435_p8 }
  0x19   :  { %443 = shalt.err (!%p440_p10)
}
  0x1a   :  { %s444_s7 = scalar_lea.vmem %s532_s15, 8192  ;;  %p449_p12 = scmp.lt.s32.totalorder %s532_s15, %s532_s15 }
  0x1b   :  { %p445_p11 = scmp.ne.s32.totalorder %s532_s15, %s444_s7  ;;  %p450_p13 = scmp.lt.s32.totalorder %s444_s7, %s444_s7 }
  0x1d   :  { %p451_p0 = por %p450_p13, %p449_p12 }
  0x1f   :  { %p452_p1 = pnand %p451_p0, %p445_p11 }
  0x21   :  { %455 = shalt.err (!%p452_p1)
}
  0x22   :  { %s508_s1 = smov 128   ;;  %s509_s8 = smov 8  }
  0x23   :  { %22 = dma.hbm_to_vmem [thread:$0]  %s725_s0, 8192, %s532_s15, [#allocation3], %s508_s1, %s508_s1, %s509_s8  }
  0x24   :  { %s510_s11 = smov [#allocation7]   ;;  %s456_s16 = scalar_lea.hbm %s727_s2, 16 }
  0x25   :  { %s39_s12 = sshll.u32 %s510_s11, 4  ;;  %p457_p2 = scmp.ne.s32.totalorder %s727_s2, %s456_s16  ;;  %s40_s12 = int_to_ptr.vmem [resolvable:$true] %s39_s12 }
  0x26   :  { %p460_p3 = scmp.lt.u32.totalorder %s456_s16, %s727_s2 }
  0x28   :  { %p462_p4 = pnand %p460_p3, %p457_p2 }
  0x2a   :  { %465 = shalt.err (!%p462_p4)
}
  0x2b   :  { %s466_s21 = scalar_lea.vmem %s40_s12, 16  ;;  %s470_s0 = scalar_lea.vmem %s40_s12, 32 }
  0x2c   :  { %p467_p5 = scmp.ne.s32.totalorder %s40_s12, %s466_s21  ;;  %p471_p6 = scmp.lt.s32.totalorder %s40_s12, %s40_s12 }
  0x2d   :  { %p472_p7 = scmp.lt.s32.totalorder %s470_s0, %s466_s21 }
  0x2f   :  { %p473_p8 = por %p472_p7, %p471_p6 }
  0x31   :  { %p474_p9 = pnand %p473_p8, %p467_p5 }
  0x33   :  { %477 = shalt.err (!%p474_p9)
}
  0x34   :  { %42 = dma.hbm_to_vmem [thread:$0]  %s727_s2, 16, %s40_s12, [#allocation6]  }
  0x35   :  { %500 = dma.done.wait [#allocation3], 8192  }
  0x36   :  { %501 = vsyncadd [#allocation3], 4294959104 }
  0x37   :  { %502 = dma.done.wait [#allocation6], 32  }
  0x38   :  { %503 = vsyncadd [#allocation6], 4294967264  ;;  %v52_v0 = vld [vmem:[#allocation2] sm:$0xff]  ;;  %v53_v4 = vld [vmem:[#allocation2 + $0x8] sm:$0xff]  ;;  %s511_s2 = smov [#allocation8]  }
  0x39   :  { %v578_v1 = vld [vmem:[#allocation5] ss:$0 sm:$0xff]  ;;  %v580_v2 = vld [vmem:[#allocation7] ss:$0 sm:$0xff]  ;;  %v54_v5 = vld [vmem:[#allocation2 + $0x10] sm:$0xff]  ;;  %s391_s23 = sshll.u32 %s511_s2, 4  ;;  %s392_s23 = int_to_ptr.vmem [resolvable:$true] %s391_s23 }
  0x3a   :  { %v123_v3 = vmul.f32 %v578_v1, %v52_v0  ;;  %v55_v6 = vld [vmem:[#allocation2 + $0x18] sm:$0xff]  ;;  %v124_v7 = vmul.f32 %v578_v1, %v53_v4  ;;  %v125_v8 = vmul.f32 %v578_v1, %v54_v5  ;;  %v56_v10 = vld [vmem:[#allocation2 + $0x20] sm:$0xff]  ;;  %v57_v11 = vld [vmem:[#allocation2 + $0x28] sm:$0xff]  ;;  %s478_s24 = scalar_lea.vmem %s392_s23, 8192  ;;  %p483_p11 = scmp.lt.s32.totalorder %s392_s23, %s392_s23 }
  0x3b   :  { %v126_v9 = vmul.f32 %v578_v1, %v55_v6  ;;  %v58_v12 = vld [vmem:[#allocation2 + $0x30] sm:$0xff]  ;;  %v127_v14 = vmul.f32 %v578_v1, %v56_v10  ;;  %v128_v15 = vmul.f32 %v578_v1, %v57_v11  ;;  %v59_v17 = vld [vmem:[#allocation2 + $0x38] sm:$0xff]  ;;  %v60_v22 = vld [vmem:[#allocation2 + $0x40] sm:$0xff]  ;;  %p479_p10 = scmp.ne.s32.totalorder %s392_s23, %s478_s24  ;;  %p484_p12 = scmp.lt.s32.totalorder %s478_s24, %s478_s24 }
  0x3c   :  { %v194_v13 = vadd.f32 %v580_v2, %v123_v3  ;;  %v129_v16 = vmul.f32 %v578_v1, %v58_v12  ;;  %v195_v18 = vadd.f32 %v580_v2, %v124_v7  ;;  %v196_v19 = vadd.f32 %v580_v2, %v125_v8  ;;  %v61_v27 = vld [vmem:[#allocation2 + $0x48] sm:$0xff]  ;;  %v62_v28 = vld [vmem:[#allocation2 + $0x50] sm:$0xff]  ;;  %v63_v29 = vld [vmem:[#allocation2 + $0x58] sm:$0xff] }
  0x3d   :  { %v197_v20 = vadd.f32 %v580_v2, %v126_v9  ;;  %v130_v21 = vmul.f32 %v578_v1, %v59_v17  ;;  %v198_v24 = vadd.f32 %v580_v2, %v127_v14  ;;  %v199_v25 = vadd.f32 %v580_v2, %v128_v15  ;;  %v64_v34 = vld [vmem:[#allocation2 + $0x60] sm:$0xff]  ;;  %v65_v35 = vld [vmem:[#allocation2 + $0x68] sm:$0xff]  ;;  %v66_v36 = vld [vmem:[#allocation2 + $0x70] sm:$0xff]  ;;  %p485_p13 = por %p484_p12, %p483_p11 }
  0x3e   :  { %v258_v23 = vmax.f32 %v194_v13, 0.0  ;;  %v200_v26 = vadd.f32 %v580_v2, %v129_v16  ;;  %v259_v30 = vmax.f32 %v195_v18, 0.0  ;;  %v260_v31 = vmax.f32 %v196_v19, 0.0  ;;  %v67_v41 = vld [vmem:[#allocation2 + $0x78] sm:$0xff]  ;;  %v68_v54 = vld [vmem:[#allocation2 + $0x80] sm:$0xff]  ;;  %v69_v59 = vld [vmem:[#allocation2 + $0x88] sm:$0xff] }
  0x3f   :  { %v261_v32 = vmax.f32 %v197_v20, 0.0  ;;  %v201_v33 = vadd.f32 %v580_v2, %v130_v21  ;;  %v262_v37 = vmax.f32 %v198_v24, 0.0  ;;  %v263_v38 = vmax.f32 %v199_v25, 0.0  ;;  %v70_v60 = vld [vmem:[#allocation2 + $0x90] sm:$0xff]  ;;  %v71_v61 = vld [vmem:[#allocation2 + $0x98] sm:$0xff]  ;;  %v72_v4 = vld [vmem:[#allocation2 + $0xa0] sm:$0xff]  ;;  %p486_p0 = pnand %p485_p13, %p479_p10 }
  0x40   :  { %322 = vst [vmem:[#allocation8] sm:$0xff] %v258_v23  ;;  %v264_v39 = vmax.f32 %v200_v26, 0.0  ;;  %v131_v40 = vmul.f32 %v578_v1, %v60_v22  ;;  %323 = vst [vmem:[#allocation8 + $0x8] sm:$0xff] %v259_v30  ;;  %v132_v43 = vmul.f32 %v578_v1, %v61_v27  ;;  %v133_v44 = vmul.f32 %v578_v1, %v62_v28  ;;  %v73_v5 = vld [vmem:[#allocation2 + $0xa8] sm:$0xff]  ;;  %v74_v6 = vld [vmem:[#allocation2 + $0xb0] sm:$0xff] }
  0x41   :  { %324 = vst [vmem:[#allocation8 + $0x10] sm:$0xff] %v260_v31  ;;  %325 = vst [vmem:[#allocation8 + $0x18] sm:$0xff] %v261_v32  ;;  %v265_v42 = vmax.f32 %v201_v33, 0.0  ;;  %v134_v45 = vmul.f32 %v578_v1, %v63_v29  ;;  %v135_v47 = vmul.f32 %v578_v1, %v64_v34  ;;  %v136_v48 = vmul.f32 %v578_v1, %v65_v35  ;;  %v75_v11 = vld [vmem:[#allocation2 + $0xb8] sm:$0xff]  ;;  %v76_v24 = vld [vmem:[#allocation2 + $0xc0] sm:$0xff] }
  0x42   :  { %326 = vst [vmem:[#allocation8 + $0x20] sm:$0xff] %v262_v37  ;;  %327 = vst [vmem:[#allocation8 + $0x28] sm:$0xff] %v263_v38  ;;  %v202_v46 = vadd.f32 %v580_v2, %v131_v40  ;;  %v137_v49 = vmul.f32 %v578_v1, %v66_v36  ;;  %v203_v50 = vadd.f32 %v580_v2, %v132_v43  ;;  %v77_v29 = vld [vmem:[#allocation2 + $0xc8] sm:$0xff]  ;;  %v78_v30 = vld [vmem:[#allocation2 + $0xd0] sm:$0xff] }
  0x43   :  { %328 = vst [vmem:[#allocation8 + $0x30] sm:$0xff] %v264_v39  ;;  %329 = vst [vmem:[#allocation8 + $0x38] sm:$0xff] %v265_v42  ;;  %v204_v51 = vadd.f32 %v580_v2, %v133_v44  ;;  %v205_v52 = vadd.f32 %v580_v2, %v134_v45  ;;  %v138_v53 = vmul.f32 %v578_v1, %v67_v41  ;;  %v79_v31 = vld [vmem:[#allocation2 + $0xd8] sm:$0xff]  ;;  %v80_v36 = vld [vmem:[#allocation2 + $0xe0] sm:$0xff] }
  0x44   :  { %v266_v55 = vmax.f32 %v202_v46, 0.0  ;;  %v206_v56 = vadd.f32 %v580_v2, %v135_v47  ;;  %v207_v57 = vadd.f32 %v580_v2, %v136_v48  ;;  %v208_v58 = vadd.f32 %v580_v2, %v137_v49  ;;  %v81_v37 = vld [vmem:[#allocation2 + $0xe8] sm:$0xff]  ;;  %v82_v38 = vld [vmem:[#allocation2 + $0xf0] sm:$0xff]  ;;  %v83_v43 = vld [vmem:[#allocation2 + $0xf8] sm:$0xff] }
  0x45   :  { %v267_v62 = vmax.f32 %v203_v50, 0.0  ;;  %v268_v63 = vmax.f32 %v204_v51, 0.0  ;;  %v269_v0 = vmax.f32 %v205_v52, 0.0  ;;  %v209_v3 = vadd.f32 %v580_v2, %v138_v53 }
  0x46   :  { %330 = vst [vmem:[#allocation8 + $0x40] sm:$0xff] %v266_v55  ;;  %v270_v7 = vmax.f32 %v206_v56, 0.0  ;;  %v271_v8 = vmax.f32 %v207_v57, 0.0  ;;  %v272_v9 = vmax.f32 %v208_v58, 0.0  ;;  %v139_v10 = vmul.f32 %v578_v1, %v68_v54  ;;  %v84_v56 = vld [vmem:[#allocation2 + $0x100] sm:$0xff] }
  0x47   :  { %331 = vst [vmem:[#allocation8 + $0x48] sm:$0xff] %v267_v62  ;;  %332 = vst [vmem:[#allocation8 + $0x50] sm:$0xff] %v268_v63  ;;  %v273_v12 = vmax.f32 %v209_v3, 0.0  ;;  %v140_v13 = vmul.f32 %v578_v1, %v69_v59  ;;  %v141_v14 = vmul.f32 %v578_v1, %v70_v60  ;;  %v142_v15 = vmul.f32 %v578_v1, %v71_v61  ;;  %v85_v61 = vld [vmem:[#allocation2 + $0x108] sm:$0xff]  ;;  %v86_v62 = vld [vmem:[#allocation2 + $0x110] sm:$0xff] }
  0x48   :  { %333 = vst [vmem:[#allocation8 + $0x58] sm:$0xff] %v269_v0  ;;  %334 = vst [vmem:[#allocation8 + $0x60] sm:$0xff] %v270_v7  ;;  %v210_v16 = vadd.f32 %v580_v2, %v139_v10  ;;  %v143_v17 = vmul.f32 %v578_v1, %v72_v4  ;;  %v144_v18 = vmul.f32 %v578_v1, %v73_v5  ;;  %v87_v63 = vld [vmem:[#allocation2 + $0x118] sm:$0xff]  ;;  %v89_v7 = vld [vmem:[#allocation2 + $0x128] sm:$0xff] }
  0x49   :  { %335 = vst [vmem:[#allocation8 + $0x68] sm:$0xff] %v271_v8  ;;  %336 = vst [vmem:[#allocation8 + $0x70] sm:$0xff] %v272_v9  ;;  %v145_v19 = vmul.f32 %v578_v1, %v74_v6  ;;  %v211_v20 = vadd.f32 %v580_v2, %v140_v13  ;;  %v212_v21 = vadd.f32 %v580_v2, %v141_v14  ;;  %v88_v6 = vld [vmem:[#allocation2 + $0x120] sm:$0xff]  ;;  %v90_v8 = vld [vmem:[#allocation2 + $0x130] sm:$0xff] }
  0x4a   :  { %337 = vst [vmem:[#allocation8 + $0x78] sm:$0xff] %v273_v12  ;;  %v213_v22 = vadd.f32 %v580_v2, %v142_v15  ;;  %v146_v23 = vmul.f32 %v578_v1, %v75_v11  ;;  %v274_v25 = vmax.f32 %v210_v16, 0.0  ;;  %v214_v26 = vadd.f32 %v580_v2, %v143_v17  ;;  %v91_v13 = vld [vmem:[#allocation2 + $0x138] sm:$0xff] }
  0x4b   :  { %v215_v27 = vadd.f32 %v580_v2, %v144_v18  ;;  %v216_v28 = vadd.f32 %v580_v2, %v145_v19  ;;  %v275_v32 = vmax.f32 %v211_v20, 0.0  ;;  %v276_v33 = vmax.f32 %v212_v21, 0.0 }
  0x4c   :  { %v277_v34 = vmax.f32 %v213_v22, 0.0  ;;  %v217_v35 = vadd.f32 %v580_v2, %v146_v23  ;;  %338 = vst [vmem:[#allocation8 + $0x80] sm:$0xff] %v274_v25  ;;  %v278_v39 = vmax.f32 %v214_v26, 0.0  ;;  %v147_v42 = vmul.f32 %v578_v1, %v76_v24  ;;  %v92_v26 = vld [vmem:[#allocation2 + $0x140] sm:$0xff] }
  0x4d   :  { %v279_v40 = vmax.f32 %v215_v27, 0.0  ;;  %v280_v41 = vmax.f32 %v216_v28, 0.0  ;;  %339 = vst [vmem:[#allocation8 + $0x88] sm:$0xff] %v275_v32  ;;  %340 = vst [vmem:[#allocation8 + $0x90] sm:$0xff] %v276_v33  ;;  %v148_v45 = vmul.f32 %v578_v1, %v77_v29  ;;  %v149_v46 = vmul.f32 %v578_v1, %v78_v30  ;;  %v94_v32 = vld [vmem:[#allocation2 + $0x150] sm:$0xff]  ;;  %v95_v33 = vld [vmem:[#allocation2 + $0x158] sm:$0xff] }
  0x4e   :  { %341 = vst [vmem:[#allocation8 + $0x98] sm:$0xff] %v277_v34  ;;  %v281_v44 = vmax.f32 %v217_v35, 0.0  ;;  %v150_v47 = vmul.f32 %v578_v1, %v79_v31  ;;  %342 = vst [vmem:[#allocation8 + $0xa0] sm:$0xff] %v278_v39  ;;  %v218_v48 = vadd.f32 %v580_v2, %v147_v42  ;;  %v151_v49 = vmul.f32 %v578_v1, %v80_v36  ;;  %v93_v31 = vld [vmem:[#allocation2 + $0x148] sm:$0xff] }
  0x4f   :  { %343 = vst [vmem:[#allocation8 + $0xa8] sm:$0xff] %v279_v40  ;;  %344 = vst [vmem:[#allocation8 + $0xb0] sm:$0xff] %v280_v41  ;;  %v152_v50 = vmul.f32 %v578_v1, %v81_v37  ;;  %v153_v51 = vmul.f32 %v578_v1, %v82_v38  ;;  %v219_v52 = vadd.f32 %v580_v2, %v148_v45  ;;  %v96_v38 = vld [vmem:[#allocation2 + $0x160] sm:$0xff]  ;;  %v97_v39 = vld [vmem:[#allocation2 + $0x168] sm:$0xff] }
  0x50   :  { %345 = vst [vmem:[#allocation8 + $0xb8] sm:$0xff] %v281_v44  ;;  %v220_v53 = vadd.f32 %v580_v2, %v149_v46  ;;  %v221_v54 = vadd.f32 %v580_v2, %v150_v47  ;;  %v154_v55 = vmul.f32 %v578_v1, %v83_v43  ;;  %v282_v57 = vmax.f32 %v218_v48, 0.0  ;;  %v98_v40 = vld [vmem:[#allocation2 + $0x170] sm:$0xff]  ;;  %v99_v45 = vld [vmem:[#allocation2 + $0x178] sm:$0xff] }
  0x51   :  { %v222_v58 = vadd.f32 %v580_v2, %v151_v49  ;;  %v223_v59 = vadd.f32 %v580_v2, %v152_v50  ;;  %v224_v60 = vadd.f32 %v580_v2, %v153_v51  ;;  %v283_v0 = vmax.f32 %v219_v52, 0.0 }
  0x52   :  { %v284_v3 = vmax.f32 %v220_v53, 0.0  ;;  %v285_v4 = vmax.f32 %v221_v54, 0.0  ;;  %v225_v5 = vadd.f32 %v580_v2, %v154_v55  ;;  %346 = vst [vmem:[#allocation8 + $0xc0] sm:$0xff] %v282_v57  ;;  %v155_v12 = vmul.f32 %v578_v1, %v84_v56 }
  0x53   :  { %v286_v9 = vmax.f32 %v222_v58, 0.0  ;;  %v287_v10 = vmax.f32 %v223_v59, 0.0  ;;  %v288_v11 = vmax.f32 %v224_v60, 0.0  ;;  %347 = vst [vmem:[#allocation8 + $0xc8] sm:$0xff] %v283_v0  ;;  %v156_v15 = vmul.f32 %v578_v1, %v85_v61  ;;  %v100_v58 = vld [vmem:[#allocation2 + $0x180] sm:$0xff]  ;;  %v102_v0 = vld [vmem:[#allocation2 + $0x190] sm:$0xff] }
  0x54   :  { %348 = vst [vmem:[#allocation8 + $0xd0] sm:$0xff] %v284_v3  ;;  %349 = vst [vmem:[#allocation8 + $0xd8] sm:$0xff] %v285_v4  ;;  %v289_v14 = vmax.f32 %v225_v5, 0.0  ;;  %v157_v16 = vmul.f32 %v578_v1, %v86_v62  ;;  %v158_v17 = vmul.f32 %v578_v1, %v87_v63  ;;  %v226_v18 = vadd.f32 %v580_v2, %v155_v12  ;;  %v101_v63 = vld [vmem:[#allocation2 + $0x188] sm:$0xff]  ;;  %v103_v3 = vld [vmem:[#allocation2 + $0x198] sm:$0xff] }
  0x55   :  { %350 = vst [vmem:[#allocation8 + $0xe0] sm:$0xff] %v286_v9  ;;  %351 = vst [vmem:[#allocation8 + $0xe8] sm:$0xff] %v287_v10  ;;  %v159_v19 = vmul.f32 %v578_v1, %v88_v6  ;;  %v160_v20 = vmul.f32 %v578_v1, %v89_v7  ;;  %v161_v21 = vmul.f32 %v578_v1, %v90_v8  ;;  %v104_v8 = vld [vmem:[#allocation2 + $0x1a0] sm:$0xff]  ;;  %v105_v9 = vld [vmem:[#allocation2 + $0x1a8] sm:$0xff] }
  0x56   :  { %352 = vst [vmem:[#allocation8 + $0xf0] sm:$0xff] %v288_v11  ;;  %353 = vst [vmem:[#allocation8 + $0xf8] sm:$0xff] %v289_v14  ;;  %v227_v22 = vadd.f32 %v580_v2, %v156_v15  ;;  %v228_v23 = vadd.f32 %v580_v2, %v157_v16  ;;  %v229_v24 = vadd.f32 %v580_v2, %v158_v17  ;;  %v290_v27 = vmax.f32 %v226_v18, 0.0  ;;  %v106_v10 = vld [vmem:[#allocation2 + $0x1b0] sm:$0xff]  ;;  %v107_v15 = vld [vmem:[#allocation2 + $0x1b8] sm:$0xff] }
  0x57   :  { %v162_v25 = vmul.f32 %v578_v1, %v91_v13  ;;  %v230_v28 = vadd.f32 %v580_v2, %v159_v19  ;;  %v231_v29 = vadd.f32 %v580_v2, %v160_v20  ;;  %v232_v30 = vadd.f32 %v580_v2, %v161_v21 }
  0x58   :  { %v291_v34 = vmax.f32 %v227_v22, 0.0  ;;  %v292_v35 = vmax.f32 %v228_v23, 0.0  ;;  %v293_v36 = vmax.f32 %v229_v24, 0.0  ;;  %354 = vst [vmem:[#allocation8 + $0x100] sm:$0xff] %v290_v27  ;;  %v163_v44 = vmul.f32 %v578_v1, %v92_v26 }
  0x59   :  { %v233_v37 = vadd.f32 %v580_v2, %v162_v25  ;;  %v294_v41 = vmax.f32 %v230_v28, 0.0  ;;  %v295_v42 = vmax.f32 %v231_v29, 0.0  ;;  %v296_v43 = vmax.f32 %v232_v30, 0.0  ;;  %v108_v28 = vld [vmem:[#allocation2 + $0x1c0] sm:$0xff] }
  0x5a   :  { %355 = vst [vmem:[#allocation8 + $0x108] sm:$0xff] %v291_v34  ;;  %356 = vst [vmem:[#allocation8 + $0x110] sm:$0xff] %v292_v35  ;;  %v164_v47 = vmul.f32 %v578_v1, %v93_v31  ;;  %v165_v48 = vmul.f32 %v578_v1, %v94_v32  ;;  %v166_v49 = vmul.f32 %v578_v1, %v95_v33  ;;  %v109_v33 = vld [vmem:[#allocation2 + $0x1c8] sm:$0xff]  ;;  %v110_v34 = vld [vmem:[#allocation2 + $0x1d0] sm:$0xff] }
  0x5b   :  { %357 = vst [vmem:[#allocation8 + $0x118] sm:$0xff] %v293_v36  ;;  %v297_v46 = vmax.f32 %v233_v37, 0.0  ;;  %358 = vst [vmem:[#allocation8 + $0x120] sm:$0xff] %v294_v41  ;;  %v234_v50 = vadd.f32 %v580_v2, %v163_v44  ;;  %v167_v51 = vmul.f32 %v578_v1, %v96_v38  ;;  %v168_v52 = vmul.f32 %v578_v1, %v97_v39  ;;  %v111_v35 = vld [vmem:[#allocation2 + $0x1d8] sm:$0xff]  ;;  %v113_v41 = vld [vmem:[#allocation2 + $0x1e8] sm:$0xff] }
  0x5c   :  { %359 = vst [vmem:[#allocation8 + $0x128] sm:$0xff] %v295_v42  ;;  %360 = vst [vmem:[#allocation8 + $0x130] sm:$0xff] %v296_v43  ;;  %v169_v53 = vmul.f32 %v578_v1, %v98_v40  ;;  %v235_v54 = vadd.f32 %v580_v2, %v164_v47  ;;  %v236_v55 = vadd.f32 %v580_v2, %v165_v48  ;;  %v112_v40 = vld [vmem:[#allocation2 + $0x1e0] sm:$0xff]  ;;  %v114_v42 = vld [vmem:[#allocation2 + $0x1f0] sm:$0xff] }
  0x5d   :  { %361 = vst [vmem:[#allocation8 + $0x138] sm:$0xff] %v297_v46  ;;  %v237_v56 = vadd.f32 %v580_v2, %v166_v49  ;;  %v170_v57 = vmul.f32 %v578_v1, %v99_v45  ;;  %v298_v59 = vmax.f32 %v234_v50, 0.0  ;;  %v238_v60 = vadd.f32 %v580_v2, %v167_v51  ;;  %v115_v47 = vld [vmem:[#allocation2 + $0x1f8] sm:$0xff] }
  0x5e   :  { %v239_v61 = vadd.f32 %v580_v2, %v168_v52  ;;  %v240_v62 = vadd.f32 %v580_v2, %v169_v53  ;;  %v299_v4 = vmax.f32 %v235_v54, 0.0  ;;  %v300_v5 = vmax.f32 %v236_v55, 0.0 }
  0x5f   :  { %v301_v6 = vmax.f32 %v237_v56, 0.0  ;;  %v241_v7 = vadd.f32 %v580_v2, %v170_v57  ;;  %362 = vst [vmem:[#allocation8 + $0x140] sm:$0xff] %v298_v59  ;;  %v302_v11 = vmax.f32 %v238_v60, 0.0  ;;  %v171_v14 = vmul.f32 %v578_v1, %v100_v58 }
  0x60   :  { %v303_v12 = vmax.f32 %v239_v61, 0.0  ;;  %v304_v13 = vmax.f32 %v240_v62, 0.0  ;;  %363 = vst [vmem:[#allocation8 + $0x148] sm:$0xff] %v299_v4  ;;  %364 = vst [vmem:[#allocation8 + $0x150] sm:$0xff] %v300_v5  ;;  %v172_v17 = vmul.f32 %v578_v1, %v101_v63  ;;  %v173_v18 = vmul.f32 %v578_v1, %v102_v0 }
  0x61   :  { %365 = vst [vmem:[#allocation8 + $0x158] sm:$0xff] %v301_v6  ;;  %v305_v16 = vmax.f32 %v241_v7, 0.0  ;;  %v174_v19 = vmul.f32 %v578_v1, %v103_v3  ;;  %366 = vst [vmem:[#allocation8 + $0x160] sm:$0xff] %v302_v11  ;;  %v242_v20 = vadd.f32 %v580_v2, %v171_v14  ;;  %v175_v21 = vmul.f32 %v578_v1, %v104_v8 }
  0x62   :  { %367 = vst [vmem:[#allocation8 + $0x168] sm:$0xff] %v303_v12  ;;  %368 = vst [vmem:[#allocation8 + $0x170] sm:$0xff] %v304_v13  ;;  %v176_v22 = vmul.f32 %v578_v1, %v105_v9  ;;  %v177_v23 = vmul.f32 %v578_v1, %v106_v10  ;;  %v243_v24 = vadd.f32 %v580_v2, %v172_v17 }
  0x63   :  { %369 = vst [vmem:[#allocation8 + $0x178] sm:$0xff] %v305_v16  ;;  %v244_v25 = vadd.f32 %v580_v2, %v173_v18  ;;  %v245_v26 = vadd.f32 %v580_v2, %v174_v19  ;;  %v178_v27 = vmul.f32 %v578_v1, %v107_v15  ;;  %v306_v29 = vmax.f32 %v242_v20, 0.0 }
  0x64   :  { %v246_v30 = vadd.f32 %v580_v2, %v175_v21  ;;  %v247_v31 = vadd.f32 %v580_v2, %v176_v22  ;;  %v248_v32 = vadd.f32 %v580_v2, %v177_v23  ;;  %v307_v36 = vmax.f32 %v243_v24, 0.0 }
  0x65   :  { %v308_v37 = vmax.f32 %v244_v25, 0.0  ;;  %v309_v38 = vmax.f32 %v245_v26, 0.0  ;;  %v249_v39 = vadd.f32 %v580_v2, %v178_v27  ;;  %370 = vst [vmem:[#allocation8 + $0x180] sm:$0xff] %v306_v29  ;;  %v179_v46 = vmul.f32 %v578_v1, %v108_v28 }
  0x66   :  { %v310_v43 = vmax.f32 %v246_v30, 0.0  ;;  %v311_v44 = vmax.f32 %v247_v31, 0.0  ;;  %v312_v45 = vmax.f32 %v248_v32, 0.0  ;;  %371 = vst [vmem:[#allocation8 + $0x188] sm:$0xff] %v307_v36  ;;  %v180_v49 = vmul.f32 %v578_v1, %v109_v33 }
  0x67   :  { %372 = vst [vmem:[#allocation8 + $0x190] sm:$0xff] %v308_v37  ;;  %373 = vst [vmem:[#allocation8 + $0x198] sm:$0xff] %v309_v38  ;;  %v313_v48 = vmax.f32 %v249_v39, 0.0  ;;  %v181_v50 = vmul.f32 %v578_v1, %v110_v34  ;;  %v182_v51 = vmul.f32 %v578_v1, %v111_v35  ;;  %v250_v52 = vadd.f32 %v580_v2, %v179_v46 }
  0x68   :  { %374 = vst [vmem:[#allocation8 + $0x1a0] sm:$0xff] %v310_v43  ;;  %375 = vst [vmem:[#allocation8 + $0x1a8] sm:$0xff] %v311_v44  ;;  %v183_v53 = vmul.f32 %v578_v1, %v112_v40  ;;  %v184_v54 = vmul.f32 %v578_v1, %v113_v41  ;;  %v185_v55 = vmul.f32 %v578_v1, %v114_v42 }
  0x69   :  { %376 = vst [vmem:[#allocation8 + $0x1b0] sm:$0xff] %v312_v45  ;;  %377 = vst [vmem:[#allocation8 + $0x1b8] sm:$0xff] %v313_v48  ;;  %v251_v56 = vadd.f32 %v580_v2, %v180_v49  ;;  %v252_v57 = vadd.f32 %v580_v2, %v181_v50  ;;  %v253_v58 = vadd.f32 %v580_v2, %v182_v51  ;;  %v314_v60 = vmax.f32 %v250_v52, 0.0 }
  0x6a   :  { %v186_v59 = vmul.f32 %v578_v1, %v115_v47  ;;  %v254_v61 = vadd.f32 %v580_v2, %v183_v53  ;;  %v255_v62 = vadd.f32 %v580_v2, %v184_v54  ;;  %v256_v63 = vadd.f32 %v580_v2, %v185_v55 }
  0x6b   :  { %v315_v0 = vmax.f32 %v251_v56, 0.0  ;;  %v316_v3 = vmax.f32 %v252_v57, 0.0  ;;  %v317_v4 = vmax.f32 %v253_v58, 0.0  ;;  %378 = vst [vmem:[#allocation8 + $0x1c0] sm:$0xff] %v314_v60 }
  0x6c   :  { %v257_v5 = vadd.f32 %v580_v2, %v186_v59  ;;  %v318_v6 = vmax.f32 %v254_v61, 0.0  ;;  %v319_v7 = vmax.f32 %v255_v62, 0.0  ;;  %v320_v8 = vmax.f32 %v256_v63, 0.0 }
  0x6d   :  { %379 = vst [vmem:[#allocation8 + $0x1c8] sm:$0xff] %v315_v0  ;;  %380 = vst [vmem:[#allocation8 + $0x1d0] sm:$0xff] %v316_v3 }
  0x6e   :  { %381 = vst [vmem:[#allocation8 + $0x1d8] sm:$0xff] %v317_v4  ;;  %v321_v1 = vmax.f32 %v257_v5, 0.0  ;;  %382 = vst [vmem:[#allocation8 + $0x1e0] sm:$0xff] %v318_v6 }
  0x6f   :  { %383 = vst [vmem:[#allocation8 + $0x1e8] sm:$0xff] %v319_v7  ;;  %384 = vst [vmem:[#allocation8 + $0x1f0] sm:$0xff] %v320_v8 }
  0x70   :  { %385 = vst [vmem:[#allocation8 + $0x1f8] sm:$0xff] %v321_v1 }
  0x71   :  { %489 = shalt.err (!%p486_p0)
}
  0x72   :  { %s490_s27 = scalar_lea.hbm %s728_s3, 8192 }
  0x73   :  { %p491_p1 = scmp.ne.s32.totalorder %s728_s3, %s490_s27  ;;  %p494_p2 = scmp.lt.u32.totalorder %s490_s27, %s728_s3 }
  0x75   :  { %p496_p3 = pnand %p494_p2, %p491_p1 }
  0x77   :  { %499 = shalt.err (!%p496_p3)
}
  0x78   :  { %397 = dma.vmem_to_hbm [thread:$0]  %s392_s23, 8192, %s728_s3, [#allocation4], %s508_s1, %s508_s1, %s509_s8  }
  0x79   :  { %504 = dma.done.wait [#allocation4], 8192  }
  0x7a   :  { %505 = vsyncadd [#allocation4], 4294959104 }
  0x7b   :  { %401 = vsyncpa [#allocation3], 1 }
  0x7c   :  { %402 = vsyncpa [#allocation6], 1 }
  0x7d   :  { %403 = vsyncpa [#allocation4], 1 }

// kernel: conv_block_forward.2
= control target key start
LH: loop header
LB: loop body
LE: loop exit
PB: predicated region body
PF: predicated region fallthrough
CT: control target
= control target key end

     0   :  { %9 = vsyncpa [#allocation4], 0  ;;  %s1769_s0 = inlined_call_operand.hbm [shape: f32[512,128], index: 0, kind: input, shape index: {}]   ;;  %s1770_s1 = inlined_call_operand.hbm [shape: f32[128,128], index: 1, kind: input, shape index: {}]   ;;  %s1771_s2 = inlined_call_operand.hbm [shape: f32[512,128], index: 2, kind: output, shape index: {0}]   ;;  %s1772_s3 = inlined_call_operand.hbm [shape: f32[1,2,128], index: 3, kind: output, shape index: {1}]  }
   0x1   :  { %10 = vsyncpa [#allocation7], 0 }
   0x2   :  { %11 = vsyncpa [#allocation5], 0 }
   0x3   :  { %12 = vsyncpa [#allocation10], 0  ;;  %s1494_s12 = smov [#allocation3]   ;;  %s1398_s16 = scalar_lea.hbm %s1769_s0, 8192 }
   0x4   :  { %s18_s13 = sshll.u32 %s1494_s12, 4  ;;  %p1399_p0 = scmp.ne.s32.totalorder %s1769_s0, %s1398_s16  ;;  %s19_s13 = int_to_ptr.vmem [resolvable:$true] %s18_s13 }
   0x5   :  { %p1402_p1 = scmp.lt.u32.totalorder %s1398_s16, %s1769_s0 }
   0x7   :  { %p1404_p2 = pnand %p1402_p1, %p1399_p0 }
   0x9   :  { %1407 = shalt.err (!%p1404_p2)
}
   0xa   :  { %s1408_s21 = scalar_lea.vmem %s19_s13, 8192  ;;  %p1413_p4 = scmp.lt.s32.totalorder %s19_s13, %s19_s13 }
   0xb   :  { %p1409_p3 = scmp.ne.s32.totalorder %s19_s13, %s1408_s21  ;;  %p1414_p5 = scmp.lt.s32.totalorder %s1408_s21, %s1408_s21 }
   0xd   :  { %p1415_p6 = por %p1414_p5, %p1413_p4 }
   0xf   :  { %p1416_p7 = pnand %p1415_p6, %p1409_p3 }
  0x11   :  { %1419 = shalt.err (!%p1416_p7)
}
  0x12   :  { %s1495_s22 = smov 128   ;;  %s1496_s23 = smov 8  }
  0x13   :  { %24 = dma.hbm_to_vmem [thread:$0]  %s1769_s0, 8192, %s19_s13, [#allocation4], %s1495_s22, %s1495_s22, %s1496_s23  }
  0x14   :  { %s1497_s26 = smov [#allocation6]   ;;  %s1420_s30 = scalar_lea.hbm %s1770_s1, 2048 }
  0x15   :  { %s30_s27 = sshll.u32 %s1497_s26, 4  ;;  %p1421_p8 = scmp.ne.s32.totalorder %s1770_s1, %s1420_s30  ;;  %s31_s27 = int_to_ptr.vmem [resolvable:$true] %s30_s27 }
  0x16   :  { %p1424_p9 = scmp.lt.u32.totalorder %s1420_s30, %s1770_s1 }
  0x18   :  { %p1426_p10 = pnand %p1424_p9, %p1421_p8 }
  0x1a   :  { %1429 = shalt.err (!%p1426_p10)
}
  0x1b   :  { %s1430_s8 = scalar_lea.vmem %s31_s27, 2048  ;;  %p1435_p12 = scmp.lt.s32.totalorder %s31_s27, %s31_s27 }
  0x1c   :  { %p1431_p11 = scmp.ne.s32.totalorder %s31_s27, %s1430_s8  ;;  %p1436_p13 = scmp.lt.s32.totalorder %s1430_s8, %s1430_s8 }
  0x1e   :  { %p1437_p0 = por %p1436_p13, %p1435_p12 }
  0x20   :  { %p1438_p1 = pnand %p1437_p0, %p1431_p11 }
  0x22   :  { %1441 = shalt.err (!%p1438_p1)
}
  0x23   :  { %36 = dma.hbm_to_vmem [thread:$0]  %s1770_s1, 2048, %s31_s27, [#allocation7], %s1495_s22, %s1495_s22, %s1496_s23  }
  0x24   :  { %1486 = dma.done.wait [#allocation4], 8192  }
  0x25   :  { %1487 = vsyncadd [#allocation4], 4294959104 }
  0x26   :  { %1488 = dma.done.wait [#allocation7], 2048  }
  0x27   :  { %1489 = vsyncadd [#allocation7], 4294965248  ;;  %v239_v0 = vld [vmem:[#allocation6] sm:$0xff]  ;;  %v240_v1 = vld [vmem:[#allocation6 + $0x8] sm:$0xff]  ;;  %s1498_s1 = smov [#allocation8]  }
  0x28   :  { %v241_v2 = vld [vmem:[#allocation6 + $0x10] sm:$0xff]  ;;  %v1344_v3 = vpack.c.bf16 %v240_v1, %v239_v0  ;;  %v242_v4 = vld [vmem:[#allocation6 + $0x18] sm:$0xff]  ;;  %v243_v6 = vld [vmem:[#allocation6 + $0x20] sm:$0xff]  ;;  %s1109_s10 = sshll.u32 %s1498_s1, 4  ;;  %s1110_s10 = int_to_ptr.vmem [resolvable:$true] %s1109_s10 }
  0x29   :  { %v1348_v5 = vpack.c.bf16 %v242_v4, %v241_v2  ;;  %v244_v7 = vld [vmem:[#allocation6 + $0x28] sm:$0xff]  ;;  %v175_v9 = vld [vmem:[#allocation3] sm:$0xff]  ;;  %v245_v10 = vld [vmem:[#allocation6 + $0x30] sm:$0xff]  ;;  %s1442_s11 = scalar_lea.vmem %s1110_s10, 8192  ;;  %p1447_p3 = scmp.lt.s32.totalorder %s1110_s10, %s1110_s10 }
  0x2a   :  { %1345 = vmatprep.subr.bf16.mxu0 %v1344_v3  ;;  %1376 = vmatprep.subr.bf16.mxu1 %v1344_v3  ;;  %v1352_v8 = vpack.c.bf16 %v244_v7, %v243_v6  ;;  %v246_v11 = vld [vmem:[#allocation6 + $0x38] sm:$0xff]  ;;  %v247_v13 = vld [vmem:[#allocation6 + $0x40] sm:$0xff]  ;;  %v248_v14 = vld [vmem:[#allocation6 + $0x48] sm:$0xff]  ;;  %p1443_p2 = scmp.ne.s32.totalorder %s1110_s10, %s1442_s11  ;;  %p1448_p4 = scmp.lt.s32.totalorder %s1442_s11, %s1442_s11 }
  0x2b   :  { %1347 = vmatpush3.bf16.msra.mxu0 %v1344_v3  ;;  %1384 = vmatpush3.bf16.msra.mxu1 %v1344_v3  ;;  %v1356_v12 = vpack.c.bf16 %v246_v11, %v245_v10  ;;  %v1360_v15 = vpack.c.bf16 %v248_v14, %v247_v13  ;;  %v249_v16 = vld [vmem:[#allocation6 + $0x50] sm:$0xff]  ;;  %v250_v17 = vld [vmem:[#allocation6 + $0x58] sm:$0xff]  ;;  %v207_v18 = vld [vmem:[#allocation3 + $0x100] sm:$0xff] }
  0x2c   :  { %1349 = vmatprep.subr.bf16.mxu0 %v1348_v5  ;;  %1377 = vmatprep.subr.bf16.mxu1 %v1348_v5  ;;  %v1364_v19 = vpack.c.bf16 %v250_v17, %v249_v16  ;;  %v251_v20 = vld [vmem:[#allocation6 + $0x60] sm:$0xff]  ;;  %v252_v21 = vld [vmem:[#allocation6 + $0x68] sm:$0xff]  ;;  %v253_v23 = vld [vmem:[#allocation6 + $0x70] sm:$0xff]  ;;  %p1449_p5 = por %p1448_p4, %p1447_p3 }
  0x2d   :  { %1248 = vmatprep.mubr.f32.mxu0 %v175_v9  ;;  %1296 = vmatprep.mubr.f32.mxu1 %v207_v18  ;;  %v1368_v22 = vpack.c.bf16 %v252_v21, %v251_v20  ;;  %v254_v24 = vld [vmem:[#allocation6 + $0x78] sm:$0xff]  ;;  %v176_v26 = vld [vmem:[#allocation3 + $0x8] sm:$0xff]  ;;  %v177_v28 = vld [vmem:[#allocation3 + $0x10] sm:$0xff] }
  0x2e   :  { %v1372_v25 = vpack.c.bf16 %v254_v24, %v253_v23  ;;  %v208_v27 = vld [vmem:[#allocation3 + $0x108] sm:$0xff]  ;;  %v209_v29 = vld [vmem:[#allocation3 + $0x110] sm:$0xff]  ;;  %v178_v30 = vld [vmem:[#allocation3 + $0x18] sm:$0xff]  ;;  %p1450_p6 = pnand %p1449_p5, %p1443_p2 }
  0x2f   :  { %1351 = vmatpush3.bf16.msra.mxu0 %v1348_v5  ;;  %1385 = vmatpush3.bf16.msra.mxu1 %v1348_v5  ;;  %v210_v31 = vld [vmem:[#allocation3 + $0x118] sm:$0xff]  ;;  %v179_v32 = vld [vmem:[#allocation3 + $0x20] sm:$0xff]  ;;  %v180_v34 = vld [vmem:[#allocation3 + $0x28] sm:$0xff] }
  0x30   :  { %1353 = vmatprep.subr.bf16.mxu0 %v1352_v8  ;;  %1378 = vmatprep.subr.bf16.mxu1 %v1352_v8  ;;  %v211_v33 = vld [vmem:[#allocation3 + $0x120] sm:$0xff]  ;;  %v212_v35 = vld [vmem:[#allocation3 + $0x128] sm:$0xff]  ;;  %v181_v36 = vld [vmem:[#allocation3 + $0x30] sm:$0xff] }
  0x31   :  { %v213_v37 = vld [vmem:[#allocation3 + $0x130] sm:$0xff]  ;;  %v182_v38 = vld [vmem:[#allocation3 + $0x38] sm:$0xff]  ;;  %v183_v40 = vld [vmem:[#allocation3 + $0x40] sm:$0xff] }
  0x32   :  { %v214_v39 = vld [vmem:[#allocation3 + $0x138] sm:$0xff]  ;;  %v215_v41 = vld [vmem:[#allocation3 + $0x140] sm:$0xff]  ;;  %v184_v42 = vld [vmem:[#allocation3 + $0x48] sm:$0xff] }
  0x33   :  { %1355 = vmatpush3.bf16.msra.mxu0 %v1352_v8  ;;  %1386 = vmatpush3.bf16.msra.mxu1 %v1352_v8  ;;  %v216_v43 = vld [vmem:[#allocation3 + $0x148] sm:$0xff]  ;;  %v185_v44 = vld [vmem:[#allocation3 + $0x50] sm:$0xff]  ;;  %v186_v46 = vld [vmem:[#allocation3 + $0x58] sm:$0xff] }
  0x34   :  { %1357 = vmatprep.subr.bf16.mxu0 %v1356_v12  ;;  %1379 = vmatprep.subr.bf16.mxu1 %v1356_v12  ;;  %v217_v45 = vld [vmem:[#allocation3 + $0x150] sm:$0xff]  ;;  %v218_v47 = vld [vmem:[#allocation3 + $0x158] sm:$0xff]  ;;  %v187_v48 = vld [vmem:[#allocation3 + $0x60] sm:$0xff] }
  0x35   :  { %v219_v49 = vld [vmem:[#allocation3 + $0x160] sm:$0xff]  ;;  %v188_v50 = vld [vmem:[#allocation3 + $0x68] sm:$0xff]  ;;  %v189_v52 = vld [vmem:[#allocation3 + $0x70] sm:$0xff] }
  0x36   :  { %v220_v51 = vld [vmem:[#allocation3 + $0x168] sm:$0xff]  ;;  %v221_v53 = vld [vmem:[#allocation3 + $0x170] sm:$0xff]  ;;  %v190_v54 = vld [vmem:[#allocation3 + $0x78] sm:$0xff] }
  0x37   :  { %1359 = vmatpush3.bf16.msra.mxu0 %v1356_v12  ;;  %1387 = vmatpush3.bf16.msra.mxu1 %v1356_v12  ;;  %v222_v55 = vld [vmem:[#allocation3 + $0x178] sm:$0xff]  ;;  %v191_v56 = vld [vmem:[#allocation3 + $0x80] sm:$0xff]  ;;  %v192_v58 = vld [vmem:[#allocation3 + $0x88] sm:$0xff] }
  0x38   :  { %1361 = vmatprep.subr.bf16.mxu0 %v1360_v15  ;;  %1380 = vmatprep.subr.bf16.mxu1 %v1360_v15  ;;  %v223_v57 = vld [vmem:[#allocation3 + $0x180] sm:$0xff]  ;;  %v224_v59 = vld [vmem:[#allocation3 + $0x188] sm:$0xff]  ;;  %v193_v60 = vld [vmem:[#allocation3 + $0x90] sm:$0xff] }
  0x39   :  { %v225_v61 = vld [vmem:[#allocation3 + $0x190] sm:$0xff]  ;;  %v194_v62 = vld [vmem:[#allocation3 + $0x98] sm:$0xff]  ;;  %v195_v0 = vld [vmem:[#allocation3 + $0xa0] sm:$0xff] }
  0x3a   :  { %v226_v63 = vld [vmem:[#allocation3 + $0x198] sm:$0xff]  ;;  %v227_v1 = vld [vmem:[#allocation3 + $0x1a0] sm:$0xff]  ;;  %v196_v2 = vld [vmem:[#allocation3 + $0xa8] sm:$0xff] }
  0x3b   :  { %1363 = vmatpush3.bf16.msra.mxu0 %v1360_v15  ;;  %1388 = vmatpush3.bf16.msra.mxu1 %v1360_v15  ;;  %v228_v3 = vld [vmem:[#allocation3 + $0x1a8] sm:$0xff]  ;;  %v197_v4 = vld [vmem:[#allocation3 + $0xb0] sm:$0xff]  ;;  %v198_v6 = vld [vmem:[#allocation3 + $0xb8] sm:$0xff] }
  0x3c   :  { %1365 = vmatprep.subr.bf16.mxu0 %v1364_v19  ;;  %1381 = vmatprep.subr.bf16.mxu1 %v1364_v19  ;;  %v229_v5 = vld [vmem:[#allocation3 + $0x1b0] sm:$0xff]  ;;  %v230_v7 = vld [vmem:[#allocation3 + $0x1b8] sm:$0xff]  ;;  %v199_v8 = vld [vmem:[#allocation3 + $0xc0] sm:$0xff] }
  0x3d   :  { %v231_v9 = vld [vmem:[#allocation3 + $0x1c0] sm:$0xff]  ;;  %v200_v10 = vld [vmem:[#allocation3 + $0xc8] sm:$0xff]  ;;  %v201_v12 = vld [vmem:[#allocation3 + $0xd0] sm:$0xff] }
  0x3e   :  { %v232_v11 = vld [vmem:[#allocation3 + $0x1c8] sm:$0xff]  ;;  %v233_v13 = vld [vmem:[#allocation3 + $0x1d0] sm:$0xff]  ;;  %v202_v14 = vld [vmem:[#allocation3 + $0xd8] sm:$0xff] }
  0x3f   :  { %1367 = vmatpush3.bf16.msra.mxu0 %v1364_v19  ;;  %1389 = vmatpush3.bf16.msra.mxu1 %v1364_v19  ;;  %v234_v15 = vld [vmem:[#allocation3 + $0x1d8] sm:$0xff]  ;;  %v203_v16 = vld [vmem:[#allocation3 + $0xe0] sm:$0xff]  ;;  %v204_v18 = vld [vmem:[#allocation3 + $0xe8] sm:$0xff] }
  0x40   :  { %1369 = vmatprep.subr.bf16.mxu0 %v1368_v22  ;;  %1382 = vmatprep.subr.bf16.mxu1 %v1368_v22  ;;  %v235_v17 = vld [vmem:[#allocation3 + $0x1e0] sm:$0xff]  ;;  %v236_v19 = vld [vmem:[#allocation3 + $0x1e8] sm:$0xff]  ;;  %v205_v20 = vld [vmem:[#allocation3 + $0xf0] sm:$0xff] }
  0x41   :  { %v237_v21 = vld [vmem:[#allocation3 + $0x1f0] sm:$0xff]  ;;  %v238_v23 = vld [vmem:[#allocation3 + $0x1f8] sm:$0xff] }
  0x43   :  { %1371 = vmatpush3.bf16.msra.mxu0 %v1368_v22  ;;  %1390 = vmatpush3.bf16.msra.mxu1 %v1368_v22  ;;  %v206_v22 = vld [vmem:[#allocation3 + $0xf8] sm:$0xff] }
  0x44   :  { %1373 = vmatprep.subr.bf16.mxu0 %v1372_v25  ;;  %1383 = vmatprep.subr.bf16.mxu1 %v1372_v25 }
  0x47   :  { %1375 = vmatpush3.bf16.msra.mxu0 %v1372_v25  ;;  %1391 = vmatpush3.bf16.msra.mxu1 %v1372_v25 }
  0x4a   :  { %1249 = vmatmul.mubr.f32.vlgmr.msra.gmra.mrb[0].mxu0 %v176_v26  ;;  %1297 = vmatmul.mubr.f32.vlgmr.msra.gmra.mrb[0].mxu1 %v208_v27 }
  0x4b   :  { %1251 = vmatprep.mubr.f32.mxu0 %v177_v28  ;;  %1299 = vmatprep.mubr.f32.mxu1 %v209_v29 }
  0x4e   :  { %1252 = vmatmul.mubr.f32.gmra.mrb[2].mxu0 %v178_v30  ;;  %1300 = vmatmul.mubr.f32.gmra.mrb[2].mxu1 %v210_v31 }
  0x4f   :  { %1254 = vmatprep.mubr.f32.mxu0 %v179_v32  ;;  %1302 = vmatprep.mubr.f32.mxu1 %v211_v33 }
  0x52   :  { %1255 = vmatmul.mubr.f32.gmra.mrb[4].mxu0 %v180_v34  ;;  %1303 = vmatmul.mubr.f32.gmra.mrb[4].mxu1 %v212_v35 }
  0x53   :  { %1257 = vmatprep.mubr.f32.mxu0 %v181_v36  ;;  %1305 = vmatprep.mubr.f32.mxu1 %v213_v37 }
  0x56   :  { %1258 = vmatmul.mubr.f32.gmra.mrb[6].mxu0 %v182_v38  ;;  %1306 = vmatmul.mubr.f32.gmra.mrb[6].mxu1 %v214_v39 }
  0x57   :  { %1260 = vmatprep.mubr.f32.mxu0 %v183_v40  ;;  %1308 = vmatprep.mubr.f32.mxu1 %v215_v41 }
  0x5a   :  { %1261 = vmatmul.mubr.f32.gmra.mrb[8].mxu0 %v184_v42  ;;  %1309 = vmatmul.mubr.f32.gmra.mrb[8].mxu1 %v216_v43 }
  0x5b   :  { %1263 = vmatprep.mubr.f32.mxu0 %v185_v44  ;;  %1311 = vmatprep.mubr.f32.mxu1 %v217_v45 }
  0x5e   :  { %1264 = vmatmul.mubr.f32.gmra.mrb[10].mxu0 %v186_v46  ;;  %1312 = vmatmul.mubr.f32.gmra.mrb[10].mxu1 %v218_v47 }
  0x5f   :  { %1266 = vmatprep.mubr.f32.mxu0 %v187_v48  ;;  %1314 = vmatprep.mubr.f32.mxu1 %v219_v49 }
  0x62   :  { %1267 = vmatmul.mubr.f32.gmra.mrb[12].mxu0 %v188_v50  ;;  %1315 = vmatmul.mubr.f32.gmra.mrb[12].mxu1 %v220_v51 }
  0x63   :  { %1269 = vmatprep.mubr.f32.mxu0 %v189_v52  ;;  %1317 = vmatprep.mubr.f32.mxu1 %v221_v53 }
  0x66   :  { %1270 = vmatmul.mubr.f32.gmra.mrb[14].mxu0 %v190_v54  ;;  %1318 = vmatmul.mubr.f32.gmra.mrb[14].mxu1 %v222_v55 }
  0x67   :  { %1272 = vmatprep.mubr.f32.mxu0 %v191_v56  ;;  %1320 = vmatprep.mubr.f32.mxu1 %v223_v57 }
  0x6a   :  { %1273 = vmatmul.mubr.f32.gmra.mrb[16].mxu0 %v192_v58  ;;  %1321 = vmatmul.mubr.f32.gmra.mrb[16].mxu1 %v224_v59 }
  0x6b   :  { %1275 = vmatprep.mubr.f32.mxu0 %v193_v60  ;;  %1323 = vmatprep.mubr.f32.mxu1 %v225_v61 }
  0x6e   :  { %1276 = vmatmul.mubr.f32.gmra.mrb[18].mxu0 %v194_v62  ;;  %1324 = vmatmul.mubr.f32.gmra.mrb[18].mxu1 %v226_v63 }
  0x6f   :  { %1278 = vmatprep.mubr.f32.mxu0 %v195_v0  ;;  %1326 = vmatprep.mubr.f32.mxu1 %v227_v1 }
  0x72   :  { %1279 = vmatmul.mubr.f32.gmra.mrb[20].mxu0 %v196_v2  ;;  %1327 = vmatmul.mubr.f32.gmra.mrb[20].mxu1 %v228_v3 }
  0x73   :  { %1281 = vmatprep.mubr.f32.mxu0 %v197_v4  ;;  %1329 = vmatprep.mubr.f32.mxu1 %v229_v5 }
  0x76   :  { %1282 = vmatmul.mubr.f32.gmra.mrb[22].mxu0 %v198_v6  ;;  %1330 = vmatmul.mubr.f32.gmra.mrb[22].mxu1 %v230_v7 }
  0x77   :  { %1284 = vmatprep.mubr.f32.mxu0 %v199_v8  ;;  %1332 = vmatprep.mubr.f32.mxu1 %v231_v9 }
  0x7a   :  { %1285 = vmatmul.mubr.f32.gmra.mrb[24].mxu0 %v200_v10  ;;  %1333 = vmatmul.mubr.f32.gmra.mrb[24].mxu1 %v232_v11 }
  0x7b   :  { %1287 = vmatprep.mubr.f32.mxu0 %v201_v12  ;;  %1335 = vmatprep.mubr.f32.mxu1 %v233_v13 }
  0x7e   :  { %1288 = vmatmul.mubr.f32.gmra.mrb[26].mxu0 %v202_v14  ;;  %1336 = vmatmul.mubr.f32.gmra.mrb[26].mxu1 %v234_v15 }
  0x7f   :  { %1290 = vmatprep.mubr.f32.mxu0 %v203_v16  ;;  %1338 = vmatprep.mubr.f32.mxu1 %v235_v17 }
  0x82   :  { %1291 = vmatmul.mubr.f32.gmra.mrb[28].mxu0 %v204_v18  ;;  %1339 = vmatmul.mubr.f32.gmra.mrb[28].mxu1 %v236_v19 }
  0x83   :  { %1293 = vmatprep.mubr.f32.mxu0 %v205_v20  ;;  %1341 = vmatprep.mubr.f32.mxu1 %v237_v21 }
  0x86   :  { %1294 = vmatmul.mubr.f32.gmra.mrb[30].mxu0 %v206_v22  ;;  %1342 = vmatmul.mubr.f32.gmra.mrb[30].mxu1 %v238_v23 }
 0x11d   :  { %v1250_v24 = vpop.f32.mrb[0].mxu0  ;;  %v1550_v25 = vpop.f32.mrb[0].mxu1 }
 0x11e   :  { %836 = vst [vmem:[#allocation8 + $0x8] sm:$0xff] %v1250_v24  ;;  %v969_v26 = vmul.f32 %v1250_v24, %v1250_v24  ;;  %v321_v27 = vpop.f32.mrb[1].mxu0  ;;  %868 = vst [vmem:[#allocation8 + $0x108] sm:$0xff] %v1550_v25  ;;  %v1553_v28 = vpop.f32.mrb[1].mxu1 }
 0x11f   :  { %835 = vst [vmem:[#allocation8] sm:$0xff] %v321_v27  ;;  %v899_v29 = vadd.f32 %v1250_v24, %v321_v27  ;;  %v968_v30 = vmul.f32 %v321_v27, %v321_v27  ;;  %867 = vst [vmem:[#allocation8 + $0x100] sm:$0xff] %v1553_v28 }
 0x121   :  { %v1032_v31 = vadd.f32 %v969_v26, %v968_v30  ;;  %v1253_v32 = vpop.f32.mrb[2].mxu0  ;;  %v1556_v33 = vpop.f32.mrb[2].mxu1 }
 0x122   :  { %838 = vst [vmem:[#allocation8 + $0x18] sm:$0xff] %v1253_v32  ;;  %v331_v34 = vpop.f32.mrb[3].mxu0  ;;  %870 = vst [vmem:[#allocation8 + $0x118] sm:$0xff] %v1556_v33  ;;  %v1559_v35 = vpop.f32.mrb[3].mxu1  ;;  %v971_v38 = vmul.f32 %v1253_v32, %v1253_v32 }
 0x123   :  { %837 = vst [vmem:[#allocation8 + $0x10] sm:$0xff] %v331_v34  ;;  %v900_v36 = vadd.f32 %v899_v29, %v331_v34  ;;  %v970_v37 = vmul.f32 %v331_v34, %v331_v34  ;;  %869 = vst [vmem:[#allocation8 + $0x110] sm:$0xff] %v1559_v35 }
 0x125   :  { %v1033_v39 = vadd.f32 %v1032_v31, %v970_v37  ;;  %v1256_v40 = vpop.f32.mrb[4].mxu0  ;;  %v901_v41 = vadd.f32 %v1253_v32, %v900_v36  ;;  %v1562_v42 = vpop.f32.mrb[4].mxu1 }
 0x126   :  { %840 = vst [vmem:[#allocation8 + $0x28] sm:$0xff] %v1256_v40  ;;  %v341_v43 = vpop.f32.mrb[5].mxu0  ;;  %872 = vst [vmem:[#allocation8 + $0x128] sm:$0xff] %v1562_v42  ;;  %v1565_v44 = vpop.f32.mrb[5].mxu1  ;;  %v973_v48 = vmul.f32 %v1256_v40, %v1256_v40 }
 0x127   :  { %839 = vst [vmem:[#allocation8 + $0x20] sm:$0xff] %v341_v43  ;;  %v902_v45 = vadd.f32 %v901_v41, %v341_v43  ;;  %v972_v46 = vmul.f32 %v341_v43, %v341_v43  ;;  %v1034_v47 = vadd.f32 %v1033_v39, %v971_v38  ;;  %871 = vst [vmem:[#allocation8 + $0x120] sm:$0xff] %v1565_v44 }
 0x129   :  { %v1035_v49 = vadd.f32 %v1034_v47, %v972_v46  ;;  %v1259_v50 = vpop.f32.mrb[6].mxu0  ;;  %v903_v51 = vadd.f32 %v1256_v40, %v902_v45  ;;  %v1568_v52 = vpop.f32.mrb[6].mxu1 }
 0x12a   :  { %842 = vst [vmem:[#allocation8 + $0x38] sm:$0xff] %v1259_v50  ;;  %v351_v53 = vpop.f32.mrb[7].mxu0  ;;  %874 = vst [vmem:[#allocation8 + $0x138] sm:$0xff] %v1568_v52  ;;  %v1571_v54 = vpop.f32.mrb[7].mxu1  ;;  %v975_v58 = vmul.f32 %v1259_v50, %v1259_v50 }
 0x12b   :  { %841 = vst [vmem:[#allocation8 + $0x30] sm:$0xff] %v351_v53  ;;  %v904_v55 = vadd.f32 %v903_v51, %v351_v53  ;;  %v974_v56 = vmul.f32 %v351_v53, %v351_v53  ;;  %v1036_v57 = vadd.f32 %v1035_v49, %v973_v48  ;;  %873 = vst [vmem:[#allocation8 + $0x130] sm:$0xff] %v1571_v54 }
 0x12d   :  { %v1037_v59 = vadd.f32 %v1036_v57, %v974_v56  ;;  %v1262_v60 = vpop.f32.mrb[8].mxu0  ;;  %v905_v61 = vadd.f32 %v1259_v50, %v904_v55  ;;  %v1574_v62 = vpop.f32.mrb[8].mxu1 }
 0x12e   :  { %844 = vst [vmem:[#allocation8 + $0x48] sm:$0xff] %v1262_v60  ;;  %v361_v63 = vpop.f32.mrb[9].mxu0  ;;  %876 = vst [vmem:[#allocation8 + $0x148] sm:$0xff] %v1574_v62  ;;  %v1577_v0 = vpop.f32.mrb[9].mxu1  ;;  %v977_v4 = vmul.f32 %v1262_v60, %v1262_v60 }
 0x12f   :  { %843 = vst [vmem:[#allocation8 + $0x40] sm:$0xff] %v361_v63  ;;  %v906_v1 = vadd.f32 %v905_v61, %v361_v63  ;;  %v976_v2 = vmul.f32 %v361_v63, %v361_v63  ;;  %v1038_v3 = vadd.f32 %v1037_v59, %v975_v58  ;;  %875 = vst [vmem:[#allocation8 + $0x140] sm:$0xff] %v1577_v0 }
 0x131   :  { %v1039_v5 = vadd.f32 %v1038_v3, %v976_v2  ;;  %v1265_v6 = vpop.f32.mrb[10].mxu0  ;;  %v907_v7 = vadd.f32 %v1262_v60, %v906_v1  ;;  %v1580_v8 = vpop.f32.mrb[10].mxu1 }
 0x132   :  { %846 = vst [vmem:[#allocation8 + $0x58] sm:$0xff] %v1265_v6  ;;  %v371_v9 = vpop.f32.mrb[11].mxu0  ;;  %878 = vst [vmem:[#allocation8 + $0x158] sm:$0xff] %v1580_v8  ;;  %v1583_v10 = vpop.f32.mrb[11].mxu1  ;;  %v979_v14 = vmul.f32 %v1265_v6, %v1265_v6 }
 0x133   :  { %845 = vst [vmem:[#allocation8 + $0x50] sm:$0xff] %v371_v9  ;;  %v908_v11 = vadd.f32 %v907_v7, %v371_v9  ;;  %v978_v12 = vmul.f32 %v371_v9, %v371_v9  ;;  %v1040_v13 = vadd.f32 %v1039_v5, %v977_v4  ;;  %877 = vst [vmem:[#allocation8 + $0x150] sm:$0xff] %v1583_v10 }
 0x135   :  { %v1041_v15 = vadd.f32 %v1040_v13, %v978_v12  ;;  %v1268_v16 = vpop.f32.mrb[12].mxu0  ;;  %v909_v17 = vadd.f32 %v1265_v6, %v908_v11  ;;  %v1586_v18 = vpop.f32.mrb[12].mxu1 }
 0x136   :  { %848 = vst [vmem:[#allocation8 + $0x68] sm:$0xff] %v1268_v16  ;;  %v381_v19 = vpop.f32.mrb[13].mxu0  ;;  %880 = vst [vmem:[#allocation8 + $0x168] sm:$0xff] %v1586_v18  ;;  %v1589_v20 = vpop.f32.mrb[13].mxu1  ;;  %v981_v24 = vmul.f32 %v1268_v16, %v1268_v16 }
 0x137   :  { %847 = vst [vmem:[#allocation8 + $0x60] sm:$0xff] %v381_v19  ;;  %v910_v21 = vadd.f32 %v909_v17, %v381_v19  ;;  %v980_v22 = vmul.f32 %v381_v19, %v381_v19  ;;  %v1042_v23 = vadd.f32 %v1041_v15, %v979_v14  ;;  %879 = vst [vmem:[#allocation8 + $0x160] sm:$0xff] %v1589_v20 }
 0x139   :  { %v1043_v26 = vadd.f32 %v1042_v23, %v980_v22  ;;  %v1271_v27 = vpop.f32.mrb[14].mxu0  ;;  %v911_v29 = vadd.f32 %v1268_v16, %v910_v21  ;;  %v1592_v30 = vpop.f32.mrb[14].mxu1 }
 0x13a   :  { %850 = vst [vmem:[#allocation8 + $0x78] sm:$0xff] %v1271_v27  ;;  %v391_v31 = vpop.f32.mrb[15].mxu0  ;;  %882 = vst [vmem:[#allocation8 + $0x178] sm:$0xff] %v1592_v30  ;;  %v1595_v32 = vpop.f32.mrb[15].mxu1  ;;  %v983_v38 = vmul.f32 %v1271_v27, %v1271_v27 }
 0x13b   :  { %849 = vst [vmem:[#allocation8 + $0x70] sm:$0xff] %v391_v31  ;;  %v912_v34 = vadd.f32 %v911_v29, %v391_v31  ;;  %v982_v36 = vmul.f32 %v391_v31, %v391_v31  ;;  %v1044_v37 = vadd.f32 %v1043_v26, %v981_v24  ;;  %881 = vst [vmem:[#allocation8 + $0x170] sm:$0xff] %v1595_v32 }
 0x13d   :  { %v1045_v39 = vadd.f32 %v1044_v37, %v982_v36  ;;  %v1274_v40 = vpop.f32.mrb[16].mxu0  ;;  %v913_v41 = vadd.f32 %v1271_v27, %v912_v34  ;;  %v1598_v43 = vpop.f32.mrb[16].mxu1 }
 0x13e   :  { %852 = vst [vmem:[#allocation8 + $0x88] sm:$0xff] %v1274_v40  ;;  %v401_v45 = vpop.f32.mrb[17].mxu0  ;;  %884 = vst [vmem:[#allocation8 + $0x188] sm:$0xff] %v1598_v43  ;;  %v1601_v46 = vpop.f32.mrb[17].mxu1  ;;  %v985_v50 = vmul.f32 %v1274_v40, %v1274_v40 }
 0x13f   :  { %851 = vst [vmem:[#allocation8 + $0x80] sm:$0xff] %v401_v45  ;;  %v914_v47 = vadd.f32 %v913_v41, %v401_v45  ;;  %v984_v48 = vmul.f32 %v401_v45, %v401_v45  ;;  %v1046_v49 = vadd.f32 %v1045_v39, %v983_v38  ;;  %883 = vst [vmem:[#allocation8 + $0x180] sm:$0xff] %v1601_v46 }
 0x141   :  { %v1047_v51 = vadd.f32 %v1046_v49, %v984_v48  ;;  %v1277_v53 = vpop.f32.mrb[18].mxu0  ;;  %v915_v55 = vadd.f32 %v1274_v40, %v914_v47  ;;  %v1604_v56 = vpop.f32.mrb[18].mxu1 }
 0x142   :  { %854 = vst [vmem:[#allocation8 + $0x98] sm:$0xff] %v1277_v53  ;;  %v411_v57 = vpop.f32.mrb[19].mxu0  ;;  %886 = vst [vmem:[#allocation8 + $0x198] sm:$0xff] %v1604_v56  ;;  %v1607_v58 = vpop.f32.mrb[19].mxu1  ;;  %v987_v63 = vmul.f32 %v1277_v53, %v1277_v53 }
 0x143   :  { %853 = vst [vmem:[#allocation8 + $0x90] sm:$0xff] %v411_v57  ;;  %v916_v59 = vadd.f32 %v915_v55, %v411_v57  ;;  %v986_v60 = vmul.f32 %v411_v57, %v411_v57  ;;  %v1048_v61 = vadd.f32 %v1047_v51, %v985_v50  ;;  %885 = vst [vmem:[#allocation8 + $0x190] sm:$0xff] %v1607_v58 }
 0x145   :  { %v1049_v1 = vadd.f32 %v1048_v61, %v986_v60  ;;  %v1280_v2 = vpop.f32.mrb[20].mxu0  ;;  %v917_v3 = vadd.f32 %v1277_v53, %v916_v59  ;;  %v1610_v4 = vpop.f32.mrb[20].mxu1 }
 0x146   :  { %856 = vst [vmem:[#allocation8 + $0xa8] sm:$0xff] %v1280_v2  ;;  %v421_v5 = vpop.f32.mrb[21].mxu0  ;;  %888 = vst [vmem:[#allocation8 + $0x1a8] sm:$0xff] %v1610_v4  ;;  %v1613_v6 = vpop.f32.mrb[21].mxu1  ;;  %v989_v12 = vmul.f32 %v1280_v2, %v1280_v2 }
 0x147   :  { %855 = vst [vmem:[#allocation8 + $0xa0] sm:$0xff] %v421_v5  ;;  %v918_v7 = vadd.f32 %v917_v3, %v421_v5  ;;  %v988_v9 = vmul.f32 %v421_v5, %v421_v5  ;;  %v1050_v11 = vadd.f32 %v1049_v1, %v987_v63  ;;  %887 = vst [vmem:[#allocation8 + $0x1a0] sm:$0xff] %v1613_v6 }
 0x149   :  { %v1051_v13 = vadd.f32 %v1050_v11, %v988_v9  ;;  %v1283_v14 = vpop.f32.mrb[22].mxu0  ;;  %v919_v15 = vadd.f32 %v1280_v2, %v918_v7  ;;  %v1616_v16 = vpop.f32.mrb[22].mxu1 }
 0x14a   :  { %858 = vst [vmem:[#allocation8 + $0xb8] sm:$0xff] %v1283_v14  ;;  %v431_v17 = vpop.f32.mrb[23].mxu0  ;;  %890 = vst [vmem:[#allocation8 + $0x1b8] sm:$0xff] %v1616_v16  ;;  %v1619_v19 = vpop.f32.mrb[23].mxu1  ;;  %v991_v24 = vmul.f32 %v1283_v14, %v1283_v14 }
 0x14b   :  { %857 = vst [vmem:[#allocation8 + $0xb0] sm:$0xff] %v431_v17  ;;  %v920_v21 = vadd.f32 %v919_v15, %v431_v17  ;;  %v990_v22 = vmul.f32 %v431_v17, %v431_v17  ;;  %v1052_v23 = vadd.f32 %v1051_v13, %v989_v12  ;;  %889 = vst [vmem:[#allocation8 + $0x1b0] sm:$0xff] %v1619_v19 }
 0x14d   :  { %v1053_v26 = vadd.f32 %v1052_v23, %v990_v22  ;;  %v1286_v27 = vpop.f32.mrb[24].mxu0  ;;  %v921_v29 = vadd.f32 %v1283_v14, %v920_v21  ;;  %v1622_v31 = vpop.f32.mrb[24].mxu1 }
 0x14e   :  { %860 = vst [vmem:[#allocation8 + $0xc8] sm:$0xff] %v1286_v27  ;;  %v441_v34 = vpop.f32.mrb[25].mxu0  ;;  %892 = vst [vmem:[#allocation8 + $0x1c8] sm:$0xff] %v1622_v31  ;;  %v1625_v36 = vpop.f32.mrb[25].mxu1  ;;  %v993_v40 = vmul.f32 %v1286_v27, %v1286_v27 }
 0x14f   :  { %859 = vst [vmem:[#allocation8 + $0xc0] sm:$0xff] %v441_v34  ;;  %v922_v37 = vadd.f32 %v921_v29, %v441_v34  ;;  %v992_v38 = vmul.f32 %v441_v34, %v441_v34  ;;  %v1054_v39 = vadd.f32 %v1053_v26, %v991_v24  ;;  %891 = vst [vmem:[#allocation8 + $0x1c0] sm:$0xff] %v1625_v36 }
 0x151   :  { %v1055_v41 = vadd.f32 %v1054_v39, %v992_v38  ;;  %v1289_v45 = vpop.f32.mrb[26].mxu0  ;;  %v923_v47 = vadd.f32 %v1286_v27, %v922_v37  ;;  %v1628_v48 = vpop.f32.mrb[26].mxu1 }
 0x152   :  { %862 = vst [vmem:[#allocation8 + $0xd8] sm:$0xff] %v1289_v45  ;;  %v451_v49 = vpop.f32.mrb[27].mxu0  ;;  %894 = vst [vmem:[#allocation8 + $0x1d8] sm:$0xff] %v1628_v48  ;;  %v1631_v50 = vpop.f32.mrb[27].mxu1  ;;  %v995_v57 = vmul.f32 %v1289_v45, %v1289_v45 }
 0x153   :  { %861 = vst [vmem:[#allocation8 + $0xd0] sm:$0xff] %v451_v49  ;;  %v924_v51 = vadd.f32 %v923_v47, %v451_v49  ;;  %v994_v53 = vmul.f32 %v451_v49, %v451_v49  ;;  %v1056_v55 = vadd.f32 %v1055_v41, %v993_v40  ;;  %893 = vst [vmem:[#allocation8 + $0x1d0] sm:$0xff] %v1631_v50 }
 0x155   :  { %v1057_v59 = vadd.f32 %v1056_v55, %v994_v53  ;;  %v1292_v60 = vpop.f32.mrb[28].mxu0  ;;  %v925_v61 = vadd.f32 %v1289_v45, %v924_v51  ;;  %v1634_v63 = vpop.f32.mrb[28].mxu1 }
 0x156   :  { %864 = vst [vmem:[#allocation8 + $0xe8] sm:$0xff] %v1292_v60  ;;  %v461_v1 = vpop.f32.mrb[29].mxu0  ;;  %896 = vst [vmem:[#allocation8 + $0x1e8] sm:$0xff] %v1634_v63  ;;  %v1637_v2 = vpop.f32.mrb[29].mxu1  ;;  %v997_v9 = vmul.f32 %v1292_v60, %v1292_v60 }
 0x157   :  { %863 = vst [vmem:[#allocation8 + $0xe0] sm:$0xff] %v461_v1  ;;  %v926_v3 = vadd.f32 %v925_v61, %v461_v1  ;;  %v996_v5 = vmul.f32 %v461_v1, %v461_v1  ;;  %v1058_v7 = vadd.f32 %v1057_v59, %v995_v57  ;;  %895 = vst [vmem:[#allocation8 + $0x1e0] sm:$0xff] %v1637_v2 }
 0x159   :  { %v1059_v11 = vadd.f32 %v1058_v7, %v996_v5  ;;  %v1295_v12 = vpop.f32.mrb[30].mxu0  ;;  %v927_v13 = vadd.f32 %v1292_v60, %v926_v3  ;;  %v1640_v14 = vpop.f32.mrb[30].mxu1 }
 0x15a   :  { %866 = vst [vmem:[#allocation8 + $0xf8] sm:$0xff] %v1295_v12  ;;  %v471_v15 = vpop.f32.mrb[31].mxu0  ;;  %898 = vst [vmem:[#allocation8 + $0x1f8] sm:$0xff] %v1640_v14  ;;  %v1643_v17 = vpop.f32.mrb[31].mxu1 }
 0x15b   :  { %865 = vst [vmem:[#allocation8 + $0xf0] sm:$0xff] %v471_v15  ;;  %v928_v21 = vadd.f32 %v927_v13, %v471_v15  ;;  %v998_v22 = vmul.f32 %v471_v15, %v471_v15  ;;  %v1060_v23 = vadd.f32 %v1059_v11, %v997_v9  ;;  %897 = vst [vmem:[#allocation8 + $0x1f0] sm:$0xff] %v1643_v17 }
 0x15c   :  { %1453 = shalt.err (!%p1450_p6)
}
 0x15d   :  { %s1454_s14 = scalar_lea.hbm %s1771_s2, 8192 }
 0x15e   :  { %p1455_p7 = scmp.ne.s32.totalorder %s1771_s2, %s1454_s14  ;;  %p1458_p8 = scmp.lt.u32.totalorder %s1454_s14, %s1771_s2 }
 0x160   :  { %p1460_p9 = pnand %p1458_p8, %p1455_p7 }
 0x162   :  { %1463 = shalt.err (!%p1460_p9)
}
 0x163   :  { %1115 = dma.vmem_to_hbm [thread:$0]  %s1110_s10, 8192, %s1771_s2, [#allocation5], %s1495_s22, %s1495_s22, %s1496_s23   ;;  %v999_v24 = vmul.f32 %v1295_v12, %v1295_v12  ;;  %v929_v26 = vadd.f32 %v1295_v12, %v928_v21  ;;  %v1061_v27 = vadd.f32 %v1060_v23, %v998_v22  ;;  %v1000_v29 = vmul.f32 %v1553_v28, %v1553_v28 }
 0x164   :  { %v1001_v38 = vmul.f32 %v1550_v25, %v1550_v25  ;;  %v1002_v41 = vmul.f32 %v1559_v35, %v1559_v35  ;;  %v1003_v49 = vmul.f32 %v1556_v33, %v1556_v33  ;;  %s1499_s2 = smov [#allocation9]   ;;  %vm1101_vm0 = vcmask 1040384  }
 0x165   :  { %v1062_v34 = vadd.f32 %v1061_v27, %v999_v24  ;;  %v930_v37 = vadd.f32 %v929_v26, %v1553_v28  ;;  %v1004_v28 = vmul.f32 %v1565_v44, %v1565_v44  ;;  %s1122_s21 = sshll.u32 %s1499_s2, 4  ;;  %s1123_s21 = int_to_ptr.vmem [resolvable:$true] %s1122_s21 }
 0x166   :  { %s1464_s22 = scalar_lea.vmem %s1123_s21, 32  ;;  %p1469_p11 = scmp.lt.s32.totalorder %s1123_s21, %s1123_s21 }
 0x167   :  { %v1063_v39 = vadd.f32 %v1062_v34, %v1000_v29  ;;  %v931_v40 = vadd.f32 %v1550_v25, %v930_v37  ;;  %v1005_v25 = vmul.f32 %v1562_v42, %v1562_v42  ;;  %p1465_p10 = scmp.ne.s32.totalorder %s1123_s21, %s1464_s22  ;;  %p1470_p12 = scmp.lt.s32.totalorder %s1464_s22, %s1464_s22 }
 0x169   :  { %v932_v45 = vadd.f32 %v931_v40, %v1559_v35  ;;  %v1064_v47 = vadd.f32 %v1063_v39, %v1001_v38  ;;  %v1006_v35 = vmul.f32 %v1571_v54, %v1571_v54  ;;  %p1471_p13 = por %p1470_p12, %p1469_p11 }
 0x16b   :  { %v1065_v51 = vadd.f32 %v1064_v47, %v1002_v41  ;;  %v933_v53 = vadd.f32 %v1556_v33, %v932_v45  ;;  %v1007_v33 = vmul.f32 %v1568_v52, %v1568_v52  ;;  %p1472_p0 = pnand %p1471_p13, %p1465_p10 }
 0x16d   :  { %v934_v55 = vadd.f32 %v933_v53, %v1565_v44  ;;  %v1066_v57 = vadd.f32 %v1065_v51, %v1003_v49  ;;  %v1008_v44 = vmul.f32 %v1577_v0, %v1577_v0 }
 0x16f   :  { %v1067_v59 = vadd.f32 %v1066_v57, %v1004_v28  ;;  %v935_v60 = vadd.f32 %v1562_v42, %v934_v55  ;;  %v1009_v42 = vmul.f32 %v1574_v62, %v1574_v62 }
 0x171   :  { %v936_v61 = vadd.f32 %v935_v60, %v1571_v54  ;;  %v1068_v1 = vadd.f32 %v1067_v59, %v1005_v25  ;;  %v1010_v54 = vmul.f32 %v1583_v10, %v1583_v10 }
 0x173   :  { %v1069_v3 = vadd.f32 %v1068_v1, %v1006_v35  ;;  %v937_v5 = vadd.f32 %v1568_v52, %v936_v61  ;;  %v1011_v52 = vmul.f32 %v1580_v8, %v1580_v8 }
 0x175   :  { %v938_v7 = vadd.f32 %v937_v5, %v1577_v0  ;;  %v1070_v9 = vadd.f32 %v1069_v3, %v1007_v33  ;;  %v1012_v0 = vmul.f32 %v1589_v20, %v1589_v20 }
 0x177   :  { %v1071_v11 = vadd.f32 %v1070_v9, %v1008_v44  ;;  %v939_v12 = vadd.f32 %v1574_v62, %v938_v7  ;;  %v1013_v62 = vmul.f32 %v1586_v18, %v1586_v18 }
 0x179   :  { %v940_v13 = vadd.f32 %v939_v12, %v1583_v10  ;;  %v1072_v15 = vadd.f32 %v1071_v11, %v1009_v42  ;;  %v1014_v10 = vmul.f32 %v1595_v32, %v1595_v32 }
 0x17b   :  { %v1073_v21 = vadd.f32 %v1072_v15, %v1010_v54  ;;  %v941_v22 = vadd.f32 %v1580_v8, %v940_v13  ;;  %v1015_v8 = vmul.f32 %v1592_v30, %v1592_v30 }
 0x17d   :  { %v942_v23 = vadd.f32 %v941_v22, %v1589_v20  ;;  %v1074_v24 = vadd.f32 %v1073_v21, %v1011_v52  ;;  %v1016_v20 = vmul.f32 %v1601_v46, %v1601_v46 }
 0x17f   :  { %v1075_v26 = vadd.f32 %v1074_v24, %v1012_v0  ;;  %v943_v27 = vadd.f32 %v1586_v18, %v942_v23  ;;  %v1017_v18 = vmul.f32 %v1598_v43, %v1598_v43 }
 0x181   :  { %v944_v29 = vadd.f32 %v943_v27, %v1595_v32  ;;  %v1076_v34 = vadd.f32 %v1075_v26, %v1013_v62  ;;  %v1018_v32 = vmul.f32 %v1607_v58, %v1607_v58 }
 0x183   :  { %v1077_v37 = vadd.f32 %v1076_v34, %v1014_v10  ;;  %v945_v38 = vadd.f32 %v1592_v30, %v944_v29  ;;  %v1019_v30 = vmul.f32 %v1604_v56, %v1604_v56 }
 0x185   :  { %v946_v39 = vadd.f32 %v945_v38, %v1601_v46  ;;  %v1078_v40 = vadd.f32 %v1077_v37, %v1015_v8  ;;  %v1020_v46 = vmul.f32 %v1613_v6, %v1613_v6 }
 0x187   :  { %v1079_v41 = vadd.f32 %v1078_v40, %v1016_v20  ;;  %v947_v45 = vadd.f32 %v1598_v43, %v946_v39  ;;  %v1021_v43 = vmul.f32 %v1610_v4, %v1610_v4 }
 0x189   :  { %v948_v47 = vadd.f32 %v947_v45, %v1607_v58  ;;  %v1080_v49 = vadd.f32 %v1079_v41, %v1017_v18  ;;  %v1022_v58 = vmul.f32 %v1619_v19, %v1619_v19 }
 0x18b   :  { %v1081_v51 = vadd.f32 %v1080_v49, %v1018_v32  ;;  %v949_v53 = vadd.f32 %v1604_v56, %v948_v47  ;;  %v1023_v56 = vmul.f32 %v1616_v16, %v1616_v16 }
 0x18d   :  { %v950_v28 = vadd.f32 %v949_v53, %v1613_v6  ;;  %v1082_v55 = vadd.f32 %v1081_v51, %v1019_v30  ;;  %v1024_v6 = vmul.f32 %v1625_v36, %v1625_v36 }
 0x18f   :  { %v1083_v57 = vadd.f32 %v1082_v55, %v1020_v46  ;;  %v951_v25 = vadd.f32 %v1610_v4, %v950_v28  ;;  %v1025_v4 = vmul.f32 %v1622_v31, %v1622_v31 }
 0x191   :  { %v952_v59 = vadd.f32 %v951_v25, %v1619_v19  ;;  %v1084_v60 = vadd.f32 %v1083_v57, %v1021_v43  ;;  %v1026_v19 = vmul.f32 %v1631_v50, %v1631_v50 }
 0x193   :  { %v1085_v35 = vadd.f32 %v1084_v60, %v1022_v58  ;;  %v953_v61 = vadd.f32 %v1616_v16, %v952_v59  ;;  %v1027_v16 = vmul.f32 %v1628_v48, %v1628_v48 }
 0x195   :  { %v954_v1 = vadd.f32 %v953_v61, %v1625_v36  ;;  %v1086_v33 = vadd.f32 %v1085_v35, %v1023_v56  ;;  %v1028_v36 = vmul.f32 %v1637_v2, %v1637_v2 }
 0x197   :  { %v1087_v3 = vadd.f32 %v1086_v33, %v1024_v6  ;;  %v955_v5 = vadd.f32 %v1622_v31, %v954_v1  ;;  %v1029_v31 = vmul.f32 %v1634_v63, %v1634_v63 }
 0x199   :  { %v956_v44 = vadd.f32 %v955_v5, %v1631_v50  ;;  %v1088_v7 = vadd.f32 %v1087_v3, %v1025_v4  ;;  %v1030_v50 = vmul.f32 %v1643_v17, %v1643_v17 }
 0x19b   :  { %v1089_v9 = vadd.f32 %v1088_v7, %v1026_v19  ;;  %v957_v42 = vadd.f32 %v1628_v48, %v956_v44  ;;  %v1031_v48 = vmul.f32 %v1640_v14, %v1640_v14 }
 0x19d   :  { %v958_v11 = vadd.f32 %v957_v42, %v1637_v2  ;;  %v1090_v12 = vadd.f32 %v1089_v9, %v1027_v16 }
 0x19f   :  { %v1091_v54 = vadd.f32 %v1090_v12, %v1028_v36  ;;  %v959_v13 = vadd.f32 %v1634_v63, %v958_v11 }
 0x1a1   :  { %v960_v15 = vadd.f32 %v959_v13, %v1643_v17  ;;  %v1092_v52 = vadd.f32 %v1091_v54, %v1029_v31 }
 0x1a3   :  { %v961_v21 = vadd.f32 %v1640_v14, %v960_v15  ;;  %v1093_v22 = vadd.f32 %v1092_v52, %v1030_v50 }
 0x1a5   :  { %v962_v2 = vrot.slane %v961_v21, 4  ;;  %v1094_v0 = vadd.f32 %v1093_v22, %v1031_v48 }
 0x1a7   :  { %v963_v23 = vadd.f32 %v962_v2, %v961_v21  ;;  %v1095_v24 = vrot.slane %v1094_v0, 4 }
 0x1a9   :  { %v964_v62 = vrot.slane %v963_v23, 2  ;;  %v1096_v26 = vadd.f32 %v1095_v24, %v1094_v0 }
 0x1ab   :  { %v965_v27 = vadd.f32 %v964_v62, %v963_v23  ;;  %v1097_v63 = vrot.slane %v1096_v26, 2 }
 0x1ad   :  { %v966_v10 = vrot.slane %v965_v27, 1  ;;  %v1098_v29 = vadd.f32 %v1097_v63, %v1096_v26 }
 0x1af   :  { %v1099_v34 = vrot.slane %v1098_v29, 1  ;;  %v967_v17 = vadd.f32 %v966_v10, %v965_v27 }
 0x1b1   :  { %v1100_v8 = vadd.f32 %v1099_v34, %v1098_v29 }
 0x1b3   :  { %v1102_v37 = vsel %vm1101_vm0, %v967_v17, %v1100_v8 }
 0x1b4   :  { %1103 = vst [vmem:[#allocation9] sm:$0x3] %v1102_v37 }
 0x1b5   :  { %1475 = shalt.err (!%p1472_p0)
}
 0x1b6   :  { %s1476_s25 = scalar_lea.hbm %s1772_s3, 32 }
 0x1b7   :  { %p1477_p1 = scmp.ne.s32.totalorder %s1772_s3, %s1476_s25  ;;  %p1480_p2 = scmp.lt.u32.totalorder %s1476_s25, %s1772_s3 }
 0x1b9   :  { %p1482_p3 = pnand %p1480_p2, %p1477_p1 }
 0x1bb   :  { %1485 = shalt.err (!%p1482_p3)
}
 0x1bc   :  { %1125 = dma.vmem_to_hbm [thread:$0]  %s1123_s21, 32, %s1772_s3, [#allocation10]  }
 0x1bd   :  { %1490 = dma.done.wait [#allocation5], 8192  }
 0x1be   :  { %1491 = vsyncadd [#allocation5], 4294959104 }
 0x1bf   :  { %1492 = dma.done.wait [#allocation10], 32  }
 0x1c0   :  { %1493 = vsyncadd [#allocation10], 4294967264 }
 0x1c1   :  { %1132 = vsyncpa [#allocation4], 1 }
 0x1c2   :  { %1133 = vsyncpa [#allocation7], 1 }
 0x1c3   :  { %1134 = vsyncpa [#allocation5], 1 }
 0x1c4   :  { %1135 = vsyncpa [#allocation10], 1 }

</bundles_post_ra>
